<compile_context>
chip_gen: v7x
topology: tpu7x:2x2x1
jax: 0.10.0
libtpu: 0.0.40
codegen_flags: <defaults>
</compile_context>

<pallas_src>
import jax
import jax.numpy as jnp
from jax.experimental import pallas as pl
from jax.experimental.pallas import tpu as pltpu

HIDDEN = 16            # `a` in the torch module
IN_DIM = 4
PAD_IN = 8             # first contraction padded to one sublane tile
OUT_FEATURES = 2
VA = 2 * HIDDEN        # fused value||advantage hidden width = 32
SLAB_W = 128           # lane-dense slab / output width
BN_EPS = 1e-5

# ---- Row offsets into the packed parameter slab.  Every block starts on an 8-row
# ---- (sublane-tile) boundary so no slice crosses a (8,128) VMEM tile.
R_W1   = 0             # (PAD_IN, HIDDEN)  rows 0..7   (rows 4..7 zero; b1 dropped)
R_G1   = 8             # (1, HIDDEN)
R_BE1  = 16            # (1, HIDDEN)
R_W2   = 24            # (HIDDEN, HIDDEN)  rows 24..39 (b2 dropped)
R_G2   = 40
R_BE2  = 48
R_WVA1 = 56            # (HIDDEN, VA)      rows 56..71  = [wv1 | wa1]
R_BVA1 = 72            # (1, VA)           = [bv1 | ba1]   (kept: ReLU precedes its BN)
R_GVA  = 80
R_BEVA = 88
R_WF   = 96            # (VA, SLAB_W)      rows 96..127 block-diag [[wv2,0],[0,wa2]]
R_BF   = 128           # (1, SLAB_W)       [bv2 | ba2 | 0...]
SLAB_ROWS = 136        # 8-row multiple; 136*128*4 B = 68 KB (negligible)


def duelling_kernel(x_ref, p_ref, out_ref):
    x = x_ref[...]                                         # (B, PAD_IN) f32, cols 4..7 zero

    def bn(h, r_gamma, r_beta, w):
        # Train-mode BatchNorm1d, single-pass stats: E[h] and E[h^2] are two
        # independent reductions (var = E[h^2] - mu^2), so they can overlap on the XLU.
        mu = jnp.mean(h, axis=0, keepdims=True)
        msq = jnp.mean(h * h, axis=0, keepdims=True)
        var = msq - mu * mu                                # biased batch variance
        inv = jax.lax.rsqrt(var + BN_EPS)
        return (h - mu) * (inv * p_ref[r_gamma:r_gamma + 1, :w]) + p_ref[r_beta:r_beta + 1, :w]

    # ---- feature_layers: Linear(4,16) -> BN -> ReLU -> Linear(16,16) -> BN -> ReLU ----
    # Linear biases b1/b2 are omitted: they cancel exactly inside train-mode BN.
    h = jnp.dot(x, p_ref[R_W1:R_W1 + PAD_IN, :HIDDEN],
                preferred_element_type=jnp.float32)
    h = jnp.maximum(bn(h, R_G1, R_BE1, HIDDEN), 0.0)
    h = jnp.dot(h, p_ref[R_W2:R_W2 + HIDDEN, :HIDDEN],
                preferred_element_type=jnp.float32)
    feats = jnp.maximum(bn(h, R_G2, R_BE2, HIDDEN), 0.0)

    # ---- fused value||advantage branch: Linear(16,32) -> ReLU -> BN(32) ----
    va = jnp.dot(feats, p_ref[R_WVA1:R_WVA1 + HIDDEN, :VA],
                 preferred_element_type=jnp.float32) + p_ref[R_BVA1:R_BVA1 + 1, :VA]
    va = bn(jnp.maximum(va, 0.0), R_GVA, R_BEVA, VA)

    # ---- final block-diagonal Linear (32 -> 128, lane padded) ----
    #   column 0       : value head   (va[:, :16] @ wv2 + bv2)
    #   columns 1..2   : advantage    (va[:, 16:] @ wa2 + ba2)
    #   columns 3..127 : exact zeros (padding)
    fin = jnp.dot(va, p_ref[R_WF:R_WF + VA, :],
                  preferred_element_type=jnp.float32) + p_ref[R_BF:R_BF + 1, :]   # (B, 128)
    val = fin[:, 0:1]                                      # (B, 1)
    adv = fin[:, 1:1 + OUT_FEATURES]                       # (B, 2)
    adv_mean = jnp.mean(adv)                               # scalar over ALL B*2 entries (torch semantics)

    # Lane-dense, unmasked store: columns 1..2 carry val + (adv - adv_mean);
    # lane 0 is 2*val - adv_mean (don't-care), lanes 3.. are don't-care; the wrapper
    # slices columns 1:3.
    out_ref[...] = val + (fin - adv_mean)


def duelling_net_forward(x, param_slab):
    """x: (B, IN_DIM) f32.  param_slab: (SLAB_ROWS, SLAB_W) f32 packed parameter slab.

    B should be a multiple of 8 for clean sublane tiling.  Do NOT zero-pad the batch
    to reach that: padded rows would corrupt the train-mode BN statistics.
    """
    B = x.shape[0]
    x_pad = jnp.pad(x, ((0, 0), (0, PAD_IN - IN_DIM)))     # clean 8-lane-aligned K

    # B-dependent scheduling hints.
    flops = 2 * B * (PAD_IN * HIDDEN + HIDDEN * HIDDEN + HIDDEN * VA + VA * SLAB_W)
    bytes_accessed = 4 * (SLAB_ROWS * SLAB_W + B * (PAD_IN + SLAB_W))

    # VMEM budget: slab + in + out + ~7 live (B,128)-equivalent f32 intermediates,
    # with 2x headroom.  Only raise the limit past the 32 MiB default scope when
    # needed; cap below v7x's 64 MiB physical VMEM (beyond that, tile the batch).
    vmem_est = 4 * (SLAB_ROWS * SLAB_W + B * PAD_IN + 8 * B * SLAB_W)
    vmem_limit = None
    if 2 * vmem_est > (32 << 20):
        vmem_limit = int(min(2 * vmem_est, 56 << 20))

    # NOTE(v7x): this grid-less call runs on one TensorCore.  To use the second core,
    # add a leading "parallel" batch grid axis (per-core tiles of 128-256 rows) --
    # but train-mode BN statistics span the whole batch, so that requires either
    # accepting per-shard statistics or a two-pass stats/normalize scheme.
    out = pl.pallas_call(
        duelling_kernel,
        out_shape=jax.ShapeDtypeStruct((B, SLAB_W), jnp.float32),
        in_specs=[pl.BlockSpec(memory_space=pltpu.MemorySpace.VMEM),
                  pl.BlockSpec(memory_space=pltpu.MemorySpace.VMEM)],
        out_specs=pl.BlockSpec(memory_space=pltpu.MemorySpace.VMEM),
        cost_estimate=pl.CostEstimate(flops=flops, transcendentals=64,
                                      bytes_accessed=bytes_accessed),
        compiler_params=pltpu.CompilerParams(vmem_limit_bytes=vmem_limit),
    )(x_pad, param_slab)
    # For very large B on v5e, prefer consuming the (B,128) slab directly downstream
    # (this slice is a second HBM pass); at small/medium B it is negligible.
    return out[:, 1:1 + OUT_FEATURES]


def init_params(key):
    """Deterministic synthetic init.  Linear weights stored as (in, out); biases,
    BN gammas/betas stored as (1, dim) rows.  b1/b2 are created (and used by the
    pure-JAX reference) but intentionally NOT packed into the kernel slab."""
    ks = jax.random.split(key, 12)

    def lin(kw, kb, fan_in, fan_out):
        bound = 1.0 / jnp.sqrt(jnp.float32(fan_in))
        w = jax.random.uniform(kw, (fan_in, fan_out), jnp.float32, -bound, bound)
        b = jax.random.uniform(kb, (1, fan_out), jnp.float32, -bound, bound)
        return w, b

    w1, b1 = lin(ks[0], ks[1], IN_DIM, HIDDEN)
    w2, b2 = lin(ks[2], ks[3], HIDDEN, HIDDEN)
    wv1, bv1 = lin(ks[4], ks[5], HIDDEN, HIDDEN)
    wv2, bv2 = lin(ks[6], ks[7], HIDDEN, 1)
    wa1, ba1 = lin(ks[8], ks[9], HIDDEN, HIDDEN)
    wa2, ba2 = lin(ks[10], ks[11], HIDDEN, OUT_FEATURES)

    ones = lambda n: jnp.ones((1, n), jnp.float32)
    zeros = lambda n: jnp.zeros((1, n), jnp.float32)

    return dict(
        w1=w1, b1=b1, g1=ones(HIDDEN), be1=zeros(HIDDEN),
        w2=w2, b2=b2, g2=ones(HIDDEN), be2=zeros(HIDDEN),
        wv1=wv1, bv1=bv1, gv=ones(HIDDEN), bev=zeros(HIDDEN),
        wv2=wv2, bv2=bv2,
        wa1=wa1, ba1=ba1, ga=ones(HIDDEN), bea=zeros(HIDDEN),
        wa2=wa2, ba2=ba2,
    )


def pack_params(p):
    """Pack parameters into one (SLAB_ROWS, 128) f32 slab (single VMEM operand).
    Every block starts on an 8-row boundary; b1/b2 are dropped (cancel in BN)."""
    slab = jnp.zeros((SLAB_ROWS, SLAB_W), jnp.float32)

    def put(s, r, a):
        return s.at[r:r + a.shape[0], :a.shape[1]].set(a)

    slab = put(slab, R_W1, p["w1"])                                      # rows 4..7 stay zero (K pad)
    slab = put(slab, R_G1, p["g1"])
    slab = put(slab, R_BE1, p["be1"])
    slab = put(slab, R_W2, p["w2"])
    slab = put(slab, R_G2, p["g2"])
    slab = put(slab, R_BE2, p["be2"])
    slab = put(slab, R_WVA1, jnp.concatenate([p["wv1"], p["wa1"]], axis=1))
    slab = put(slab, R_BVA1, jnp.concatenate([p["bv1"], p["ba1"]], axis=1))
    slab = put(slab, R_GVA, jnp.concatenate([p["gv"], p["ga"]], axis=1))
    slab = put(slab, R_BEVA, jnp.concatenate([p["bev"], p["bea"]], axis=1))
    # Block-diagonal final linear, lane-padded to SLAB_W.
    slab = slab.at[R_WF:R_WF + HIDDEN, 0:1].set(p["wv2"])
    slab = slab.at[R_WF + HIDDEN:R_WF + VA, 1:1 + OUT_FEATURES].set(p["wa2"])
    slab = slab.at[R_BF:R_BF + 1, 0:1].set(p["bv2"])
    slab = slab.at[R_BF:R_BF + 1, 1:1 + OUT_FEATURES].set(p["ba2"])
    return slab


def duelling_net_reference(x, p):
    """Pure-JAX reference of the torch forward (train-mode BN), using the original
    un-fused parameters INCLUDING b1/b2 and the two-pass variance formula."""
    def bn(h, g, b):
        mu = h.mean(0, keepdims=True)
        var = ((h - mu) ** 2).mean(0, keepdims=True)
        return (h - mu) / jnp.sqrt(var + BN_EPS) * g + b

    h = jnp.maximum(bn(x @ p["w1"] + p["b1"], p["g1"], p["be1"]), 0.0)
    feats = jnp.maximum(bn(h @ p["w2"] + p["b2"], p["g2"], p["be2"]), 0.0)
    v = bn(jnp.maximum(feats @ p["wv1"] + p["bv1"], 0.0), p["gv"], p["bev"])
    val = v @ p["wv2"] + p["bv2"]
    a = bn(jnp.maximum(feats @ p["wa1"] + p["ba1"], 0.0), p["ga"], p["bea"])
    adv = a @ p["wa2"] + p["ba2"]
    return val + (adv - adv.mean())


if __name__ == "__main__":
    key = jax.random.PRNGKey(0)
    k_x, k_p = jax.random.split(key)

    # B=128: the review's recommended per-call row count (amortizes fixed launch/DMA
    # overhead); still tiny (2 KB of input).
    B = 128
    x = jax.random.normal(k_x, (B, IN_DIM), jnp.float32)
    params = init_params(k_p)
    param_slab = pack_params(params)

    out = jax.block_until_ready(duelling_net_forward(x, param_slab))

    ref = duelling_net_reference(x, params)
    assert out.shape == (B, OUT_FEATURES), out.shape
    assert jnp.allclose(out, ref, atol=1e-4, rtol=1e-4), (out, ref)

    print("KERNEL_OK")
</pallas_src>

<mosaic_0001>
module attributes {stable_mosaic.version = 11 : i64} {
  func.func @duelling_kernel(%arg0: memref<128x8xf32, #tpu.memory_space<vmem>>, %arg1: memref<136x128xf32, #tpu.memory_space<vmem>>, %arg2: memref<128x128xf32, #tpu.memory_space<vmem>>) attributes {dimension_semantics = [], scalar_prefetch = 0 : i64, scratch_operands = 0 : i64, tpu.core_type = #tpu.core_type<tc>} {
    %c0 = arith.constant 0 : index
    %c0_0 = arith.constant 0 : index
    %0 = vector.load %arg0[%c0, %c0_0] : memref<128x8xf32, #tpu.memory_space<vmem>>, vector<128x8xf32>
    %c0_1 = arith.constant 0 : index
    %c0_2 = arith.constant 0 : index
    %1 = vector.load %arg1[%c0_1, %c0_2] : memref<136x128xf32, #tpu.memory_space<vmem>>, vector<8x16xf32>
    %cst = arith.constant dense<0.000000e+00> : vector<128x16xf32>
    %2 = tpu.matmul %0, %1, %cst {dimension_numbers = #tpu.dot_dimension_numbers<[1], [0], [0], [1], [0, 0, 1, 1], [], []>} : vector<128x8xf32>, vector<8x16xf32>, vector<128x16xf32> -> vector<128x16xf32>
    %cst_3 = arith.constant dense<0.000000e+00> : vector<16xf32>
    %3 = vector.multi_reduction <add>, %2, %cst_3 [0] : vector<128x16xf32> to vector<16xf32>
    %4 = vector.shape_cast %3 : vector<16xf32> to vector<1x16xf32>
    %cst_4 = arith.constant 1.280000e+02 : f32
    %5 = vector.broadcast %cst_4 : f32 to vector<1x16xf32>
    %6 = arith.divf %4, %5 : vector<1x16xf32>
    %7 = arith.mulf %2, %2 : vector<128x16xf32>
    %cst_5 = arith.constant dense<0.000000e+00> : vector<16xf32>
    %8 = vector.multi_reduction <add>, %7, %cst_5 [0] : vector<128x16xf32> to vector<16xf32>
    %9 = vector.shape_cast %8 : vector<16xf32> to vector<1x16xf32>
    %cst_6 = arith.constant 1.280000e+02 : f32
    %10 = vector.broadcast %cst_6 : f32 to vector<1x16xf32>
    %11 = arith.divf %9, %10 : vector<1x16xf32>
    %12 = arith.mulf %6, %6 : vector<1x16xf32>
    %13 = arith.subf %11, %12 : vector<1x16xf32>
    %cst_7 = arith.constant 9.99999974E-6 : f32
    %14 = vector.broadcast %cst_7 : f32 to vector<1x16xf32>
    %15 = arith.addf %13, %14 : vector<1x16xf32>
    %16 = math.rsqrt %15 : vector<1x16xf32>
    %17 = vector.broadcast %6 : vector<1x16xf32> to vector<128x16xf32>
    %18 = arith.subf %2, %17 : vector<128x16xf32>
    %c8 = arith.constant 8 : index
    %c0_8 = arith.constant 0 : index
    %19 = vector.load %arg1[%c8, %c0_8] : memref<136x128xf32, #tpu.memory_space<vmem>>, vector<1x16xf32>
    %20 = arith.mulf %16, %19 : vector<1x16xf32>
    %21 = vector.broadcast %20 : vector<1x16xf32> to vector<128x16xf32>
    %22 = arith.mulf %18, %21 : vector<128x16xf32>
    %c16 = arith.constant 16 : index
    %c0_9 = arith.constant 0 : index
    %23 = vector.load %arg1[%c16, %c0_9] : memref<136x128xf32, #tpu.memory_space<vmem>>, vector<1x16xf32>
    %24 = vector.broadcast %23 : vector<1x16xf32> to vector<128x16xf32>
    %25 = arith.addf %22, %24 : vector<128x16xf32>
    %cst_10 = arith.constant 0.000000e+00 : f32
    %26 = vector.broadcast %cst_10 : f32 to vector<128x16xf32>
    %27 = arith.maximumf %25, %26 : vector<128x16xf32>
    %c24 = arith.constant 24 : index
    %c0_11 = arith.constant 0 : index
    %28 = vector.load %arg1[%c24, %c0_11] : memref<136x128xf32, #tpu.memory_space<vmem>>, vector<16x16xf32>
    %cst_12 = arith.constant dense<0.000000e+00> : vector<128x16xf32>
    %29 = tpu.matmul %27, %28, %cst_12 {dimension_numbers = #tpu.dot_dimension_numbers<[1], [0], [0], [1], [0, 0, 1, 1], [], []>} : vector<128x16xf32>, vector<16x16xf32>, vector<128x16xf32> -> vector<128x16xf32>
    %cst_13 = arith.constant dense<0.000000e+00> : vector<16xf32>
    %30 = vector.multi_reduction <add>, %29, %cst_13 [0] : vector<128x16xf32> to vector<16xf32>
    %31 = vector.shape_cast %30 : vector<16xf32> to vector<1x16xf32>
    %cst_14 = arith.constant 1.280000e+02 : f32
    %32 = vector.broadcast %cst_14 : f32 to vector<1x16xf32>
    %33 = arith.divf %31, %32 : vector<1x16xf32>
    %34 = arith.mulf %29, %29 : vector<128x16xf32>
    %cst_15 = arith.constant dense<0.000000e+00> : vector<16xf32>
    %35 = vector.multi_reduction <add>, %34, %cst_15 [0] : vector<128x16xf32> to vector<16xf32>
    %36 = vector.shape_cast %35 : vector<16xf32> to vector<1x16xf32>
    %cst_16 = arith.constant 1.280000e+02 : f32
    %37 = vector.broadcast %cst_16 : f32 to vector<1x16xf32>
    %38 = arith.divf %36, %37 : vector<1x16xf32>
    %39 = arith.mulf %33, %33 : vector<1x16xf32>
    %40 = arith.subf %38, %39 : vector<1x16xf32>
    %cst_17 = arith.constant 9.99999974E-6 : f32
    %41 = vector.broadcast %cst_17 : f32 to vector<1x16xf32>
    %42 = arith.addf %40, %41 : vector<1x16xf32>
    %43 = math.rsqrt %42 : vector<1x16xf32>
    %44 = vector.broadcast %33 : vector<1x16xf32> to vector<128x16xf32>
    %45 = arith.subf %29, %44 : vector<128x16xf32>
    %c40 = arith.constant 40 : index
    %c0_18 = arith.constant 0 : index
    %46 = vector.load %arg1[%c40, %c0_18] : memref<136x128xf32, #tpu.memory_space<vmem>>, vector<1x16xf32>
    %47 = arith.mulf %43, %46 : vector<1x16xf32>
    %48 = vector.broadcast %47 : vector<1x16xf32> to vector<128x16xf32>
    %49 = arith.mulf %45, %48 : vector<128x16xf32>
    %c48 = arith.constant 48 : index
    %c0_19 = arith.constant 0 : index
    %50 = vector.load %arg1[%c48, %c0_19] : memref<136x128xf32, #tpu.memory_space<vmem>>, vector<1x16xf32>
    %51 = vector.broadcast %50 : vector<1x16xf32> to vector<128x16xf32>
    %52 = arith.addf %49, %51 : vector<128x16xf32>
    %cst_20 = arith.constant 0.000000e+00 : f32
    %53 = vector.broadcast %cst_20 : f32 to vector<128x16xf32>
    %54 = arith.maximumf %52, %53 : vector<128x16xf32>
    %c56 = arith.constant 56 : index
    %c0_21 = arith.constant 0 : index
    %55 = vector.load %arg1[%c56, %c0_21] : memref<136x128xf32, #tpu.memory_space<vmem>>, vector<16x32xf32>
    %cst_22 = arith.constant dense<0.000000e+00> : vector<128x32xf32>
    %56 = tpu.matmul %54, %55, %cst_22 {dimension_numbers = #tpu.dot_dimension_numbers<[1], [0], [0], [1], [0, 0, 1, 1], [], []>} : vector<128x16xf32>, vector<16x32xf32>, vector<128x32xf32> -> vector<128x32xf32>
    %c72 = arith.constant 72 : index
    %c0_23 = arith.constant 0 : index
    %57 = vector.load %arg1[%c72, %c0_23] : memref<136x128xf32, #tpu.memory_space<vmem>>, vector<1x32xf32>
    %58 = vector.broadcast %57 : vector<1x32xf32> to vector<128x32xf32>
    %59 = arith.addf %56, %58 : vector<128x32xf32>
    %cst_24 = arith.constant 0.000000e+00 : f32
    %60 = vector.broadcast %cst_24 : f32 to vector<128x32xf32>
    %61 = arith.maximumf %59, %60 : vector<128x32xf32>
    %cst_25 = arith.constant dense<0.000000e+00> : vector<32xf32>
    %62 = vector.multi_reduction <add>, %61, %cst_25 [0] : vector<128x32xf32> to vector<32xf32>
    %63 = vector.shape_cast %62 : vector<32xf32> to vector<1x32xf32>
    %cst_26 = arith.constant 1.280000e+02 : f32
    %64 = vector.broadcast %cst_26 : f32 to vector<1x32xf32>
    %65 = arith.divf %63, %64 : vector<1x32xf32>
    %66 = arith.mulf %61, %61 : vector<128x32xf32>
    %cst_27 = arith.constant dense<0.000000e+00> : vector<32xf32>
    %67 = vector.multi_reduction <add>, %66, %cst_27 [0] : vector<128x32xf32> to vector<32xf32>
    %68 = vector.shape_cast %67 : vector<32xf32> to vector<1x32xf32>
    %cst_28 = arith.constant 1.280000e+02 : f32
    %69 = vector.broadcast %cst_28 : f32 to vector<1x32xf32>
    %70 = arith.divf %68, %69 : vector<1x32xf32>
    %71 = arith.mulf %65, %65 : vector<1x32xf32>
    %72 = arith.subf %70, %71 : vector<1x32xf32>
    %cst_29 = arith.constant 9.99999974E-6 : f32
    %73 = vector.broadcast %cst_29 : f32 to vector<1x32xf32>
    %74 = arith.addf %72, %73 : vector<1x32xf32>
    %75 = math.rsqrt %74 : vector<1x32xf32>
    %76 = vector.broadcast %65 : vector<1x32xf32> to vector<128x32xf32>
    %77 = arith.subf %61, %76 : vector<128x32xf32>
    %c80 = arith.constant 80 : index
    %c0_30 = arith.constant 0 : index
    %78 = vector.load %arg1[%c80, %c0_30] : memref<136x128xf32, #tpu.memory_space<vmem>>, vector<1x32xf32>
    %79 = arith.mulf %75, %78 : vector<1x32xf32>
    %80 = vector.broadcast %79 : vector<1x32xf32> to vector<128x32xf32>
    %81 = arith.mulf %77, %80 : vector<128x32xf32>
    %c88 = arith.constant 88 : index
    %c0_31 = arith.constant 0 : index
    %82 = vector.load %arg1[%c88, %c0_31] : memref<136x128xf32, #tpu.memory_space<vmem>>, vector<1x32xf32>
    %83 = vector.broadcast %82 : vector<1x32xf32> to vector<128x32xf32>
    %84 = arith.addf %81, %83 : vector<128x32xf32>
    %c96 = arith.constant 96 : index
    %c0_32 = arith.constant 0 : index
    %85 = vector.load %arg1[%c96, %c0_32] : memref<136x128xf32, #tpu.memory_space<vmem>>, vector<32x128xf32>
    %cst_33 = arith.constant dense<0.000000e+00> : vector<128x128xf32>
    %86 = tpu.matmul %84, %85, %cst_33 {dimension_numbers = #tpu.dot_dimension_numbers<[1], [0], [0], [1], [0, 0, 1, 1], [], []>} : vector<128x32xf32>, vector<32x128xf32>, vector<128x128xf32> -> vector<128x128xf32>
    %c128 = arith.constant 128 : index
    %c0_34 = arith.constant 0 : index
    %87 = vector.load %arg1[%c128, %c0_34] : memref<136x128xf32, #tpu.memory_space<vmem>>, vector<1x128xf32>
    %88 = vector.broadcast %87 : vector<1x128xf32> to vector<128x128xf32>
    %89 = arith.addf %86, %88 : vector<128x128xf32>
    %90 = vector.extract_strided_slice %89 {offsets = [0, 0], sizes = [128, 1], strides = [1, 1]} : vector<128x128xf32> to vector<128x1xf32>
    %91 = vector.extract_strided_slice %89 {offsets = [0, 1], sizes = [128, 2], strides = [1, 1]} : vector<128x128xf32> to vector<128x2xf32>
    %92 = vector.shape_cast %91 : vector<128x2xf32> to vector<1x128x2xf32>
    %cst_35 = arith.constant dense<0.000000e+00> : vector<1xf32>
    %93 = vector.multi_reduction <add>, %92, %cst_35 [1, 2] : vector<1x128x2xf32> to vector<1xf32>
    %94 = vector.shape_cast %93 : vector<1xf32> to vector<1x1x1xf32>
    %95 = vector.extract %94[0, 0, 0] : f32 from vector<1x1x1xf32>
    %cst_36 = arith.constant 2.560000e+02 : f32
    %96 = arith.divf %95, %cst_36 : f32
    %97 = vector.broadcast %96 : f32 to vector<128x128xf32>
    %98 = arith.subf %89, %97 : vector<128x128xf32>
    %99 = vector.broadcast %90 : vector<128x1xf32> to vector<128x128xf32>
    %100 = arith.addf %99, %98 : vector<128x128xf32>
    %c0_37 = arith.constant 0 : index
    %c0_38 = arith.constant 0 : index
    %101 = vector.load %arg2[%c0_37, %c0_38] : memref<128x128xf32, #tpu.memory_space<vmem>>, vector<128x128xf32>
    tpu.vector_store %arg2[%c0_37, %c0_38], %100 {strides = array<i32>} : memref<128x128xf32, #tpu.memory_space<vmem>>, vector<128x128xf32>,
    return
  }
}

</mosaic_0001>

<bundles_post_ra>
// kernel: tpu_custom_call.1
= control target key start
LH: loop header
LB: loop body
LE: loop exit
PB: predicated region body
PF: predicated region fallthrough
CT: control target
= control target key end

     0   :  { %vm29_vm0 = vcmask 64512   ;;  %s2580_s0 = inlined_call_operand.vmem [shape: f32[128,8], index: 0, kind: input, shape index: {}]   ;;  %s2581_s1 = inlined_call_operand.vmem [shape: f32[136,128], index: 1, kind: input, shape index: {}]   ;;  %s2582_s2 = inlined_call_operand.hbm [shape: f32[128,128], index: 2, kind: output, shape index: {}]  }
   0x1   :  { %v28_v0 = vld [vmem:[%s2581_s1] sm:$0xff]  ;;  %v13_v2 = vld [vmem:[%s2580_s0 + $0x8] sm:$0xff]  ;;  %v14_v3 = vld [vmem:[%s2580_s0 + $0x10] sm:$0xff] }
   0x2   :  { %v12_v1 = vld [vmem:[%s2580_s0] sm:$0xff]  ;;  %1715 = vmatprep.subr.mxu0 %v28_v0  ;;  %v15_v4 = vld [vmem:[%s2580_s0 + $0x18] sm:$0xff] }
   0x3   :  { %1717 = vmatprep.mubr.msk.f32.mxu0 %vm29_vm0, %v12_v1  ;;  %1716 = vmatpush3.msra.mxu0 %v28_v0  ;;  %v16_v5 = vld [vmem:[%s2580_s0 + $0x20] sm:$0xff] }
   0x4   :  { %1718 = vmatmul.mubr.msk.f32.vlgmr.msra.gmra.mrb[0].mxu0 %vm29_vm0, %v13_v2 }
   0x5   :  { %1720 = vmatprep.mubr.msk.f32.mxu0 %vm29_vm0, %v14_v3 }
   0x6   :  { %7 = vsyncpa [#allocation3], 0  ;;  %v17_v6 = vld [vmem:[%s2580_s0 + $0x28] sm:$0xff]  ;;  %v18_v7 = vld [vmem:[%s2580_s0 + $0x30] sm:$0xff]  ;;  %vm223_vm1 = vcmask 130048   ;;  %vm978_vm2 = vcmask 261120  }
   0x7   :  { %v19_v8 = vld [vmem:[%s2580_s0 + $0x38] sm:$0xff]  ;;  %v20_v9 = vld [vmem:[%s2580_s0 + $0x40] sm:$0xff]  ;;  %v21_v10 = vld [vmem:[%s2580_s0 + $0x48] sm:$0xff]  ;;  %s1885_s18 = smov 127   ;;  %vm1400_vm3 = vcmask 15360   ;;  %s1886_s19 = smov [#allocation2]  }
   0x8   :  { %1721 = vmatmul.mubr.msk.f32.gmra.mrb[2].mxu0 %vm29_vm0, %v15_v4  ;;  %v22_v11 = vld [vmem:[%s2580_s0 + $0x50] sm:$0xff]  ;;  %v23_v12 = vld [vmem:[%s2580_s0 + $0x58] sm:$0xff]  ;;  %v24_v13 = vld [vmem:[%s2580_s0 + $0x60] sm:$0xff]  ;;  %s1562_s20 = sshll.u32 %s1886_s19, 4  ;;  %s1563_s20 = int_to_ptr.vmem [resolvable:$true] %s1562_s20 }
   0x9   :  { %1723 = vmatprep.mubr.msk.f32.mxu0 %vm29_vm0, %v16_v5  ;;  %v25_v14 = vld [vmem:[%s2580_s0 + $0x68] sm:$0xff]  ;;  %v26_v15 = vld [vmem:[%s2580_s0 + $0x70] sm:$0xff]  ;;  %v27_v16 = vld [vmem:[%s2580_s0 + $0x78] sm:$0xff]  ;;  %s1860_s21 = scalar_lea.vmem %s1563_s20, 2048  ;;  %p1865_p1 = scmp.lt.s32.totalorder %s1563_s20, %s1563_s20 }
   0xa   :  { %v396_v17 = vld [vmem:[%s2581_s1 + $0x18] sm:$0xff]  ;;  %v397_v18 = vld [vmem:[%s2581_s1 + $0x20] sm:$0xff]  ;;  %p1861_p0 = scmp.ne.s32.totalorder %s1563_s20, %s1860_s21  ;;  %p1866_p2 = scmp.lt.s32.totalorder %s1860_s21, %s1860_s21 }
   0xb   :  { %v1829_v19 = vpack.c.bf16 %v397_v18, %v396_v17 }
   0xc   :  { %1724 = vmatmul.mubr.msk.f32.gmra.mrb[4].mxu0 %vm29_vm0, %v17_v6  ;;  %p1867_p3 = por %p1866_p2, %p1865_p1 }
   0xd   :  { %1726 = vmatprep.mubr.msk.f32.mxu0 %vm29_vm0, %v18_v7  ;;  %1830 = vmatprep.subr.bf16.mxu1 %v1829_v19 }
   0xe   :  { %1832 = vmatpush3.bf16.msra.mxu1 %v1829_v19  ;;  %p1868_p4 = pnand %p1867_p3, %p1861_p0 }
  0x10   :  { %1727 = vmatmul.mubr.msk.f32.gmra.mrb[6].mxu0 %vm29_vm0, %v19_v8 }
  0x11   :  { %1729 = vmatprep.mubr.msk.f32.mxu0 %vm29_vm0, %v20_v9 }
  0x14   :  { %1730 = vmatmul.mubr.msk.f32.gmra.mrb[8].mxu0 %vm29_vm0, %v21_v10 }
  0x15   :  { %1732 = vmatprep.mubr.msk.f32.mxu0 %vm29_vm0, %v22_v11 }
  0x18   :  { %1733 = vmatmul.mubr.msk.f32.gmra.mrb[10].mxu0 %vm29_vm0, %v23_v12 }
  0x19   :  { %1735 = vmatprep.mubr.msk.f32.mxu0 %vm29_vm0, %v24_v13 }
  0x1c   :  { %1736 = vmatmul.mubr.msk.f32.gmra.mrb[12].mxu0 %vm29_vm0, %v25_v14 }
  0x1d   :  { %1738 = vmatprep.mubr.msk.f32.mxu0 %vm29_vm0, %v26_v15 }
  0x20   :  { %1739 = vmatmul.mubr.msk.f32.gmra.mrb[14].mxu0 %vm29_vm0, %v27_v16 }
  0xd7   :  { %v1977_v20 = vpop.f32.mrb[0].mxu0 }
  0xd8   :  { %v225_v21 = vsel %vm223_vm1, %v1977_v20, 0.0  ;;  %v264_v22 = vmul.f32 %v1977_v20, %v1977_v20  ;;  %v1983_v23 = vpop.f32.mrb[1].mxu0 }
  0xd9   :  { %v224_v24 = vsel %vm223_vm1, %v1983_v23, 0.0  ;;  %v263_v25 = vmul.f32 %v1983_v23, %v1983_v23 }
  0xda   :  { %v280_v26 = vsel %vm223_vm1, %v264_v22, 0.0  ;;  %v226_v27 = vadd.f32 %v225_v21, %v224_v24 }
  0xdb   :  { %v279_v28 = vsel %vm223_vm1, %v263_v25, 0.0  ;;  %v1991_v29 = vpop.f32.mrb[2].mxu0 }
  0xdc   :  { %v281_v30 = vadd.f32 %v280_v26, %v279_v28  ;;  %v1993_v31 = vpop.f32.mrb[3].mxu0  ;;  %v266_v32 = vmul.f32 %v1991_v29, %v1991_v29  ;;  %v229_v36 = vsel %vm223_vm1, %v1991_v29, 0.0 }
  0xdd   :  { %v227_v33 = vsel %vm223_vm1, %v1993_v31, 0.0  ;;  %v265_v34 = vmul.f32 %v1993_v31, %v1993_v31 }
  0xde   :  { %v228_v35 = vadd.f32 %v227_v33, %v226_v27  ;;  %v284_v42 = vsel %vm223_vm1, %v266_v32, 0.0 }
  0xdf   :  { %v282_v37 = vsel %vm223_vm1, %v265_v34, 0.0  ;;  %v2004_v38 = vpop.f32.mrb[4].mxu0 }
  0xe0   :  { %v283_v39 = vadd.f32 %v282_v37, %v281_v30  ;;  %v2006_v40 = vpop.f32.mrb[5].mxu0  ;;  %v230_v41 = vadd.f32 %v229_v36, %v228_v35  ;;  %v268_v43 = vmul.f32 %v2004_v38, %v2004_v38  ;;  %v233_v48 = vsel %vm223_vm1, %v2004_v38, 0.0 }
  0xe1   :  { %v231_v44 = vsel %vm223_vm1, %v2006_v40, 0.0  ;;  %v267_v45 = vmul.f32 %v2006_v40, %v2006_v40 }
  0xe2   :  { %v232_v46 = vadd.f32 %v231_v44, %v230_v41  ;;  %v285_v47 = vadd.f32 %v284_v42, %v283_v39  ;;  %v288_v54 = vsel %vm223_vm1, %v268_v43, 0.0 }
  0xe3   :  { %v286_v49 = vsel %vm223_vm1, %v267_v45, 0.0  ;;  %v2018_v50 = vpop.f32.mrb[6].mxu0 }
  0xe4   :  { %v287_v51 = vadd.f32 %v286_v49, %v285_v47  ;;  %v2020_v52 = vpop.f32.mrb[7].mxu0  ;;  %v234_v53 = vadd.f32 %v233_v48, %v232_v46  ;;  %v270_v55 = vmul.f32 %v2018_v50, %v2018_v50  ;;  %v237_v60 = vsel %vm223_vm1, %v2018_v50, 0.0 }
  0xe5   :  { %v235_v56 = vsel %vm223_vm1, %v2020_v52, 0.0  ;;  %v269_v57 = vmul.f32 %v2020_v52, %v2020_v52 }
  0xe6   :  { %v236_v58 = vadd.f32 %v235_v56, %v234_v53  ;;  %v289_v59 = vadd.f32 %v288_v54, %v287_v51  ;;  %v292_v2 = vsel %vm223_vm1, %v270_v55, 0.0 }
  0xe7   :  { %v290_v61 = vsel %vm223_vm1, %v269_v57, 0.0  ;;  %v2032_v62 = vpop.f32.mrb[8].mxu0 }
  0xe8   :  { %v291_v63 = vadd.f32 %v290_v61, %v289_v59  ;;  %v2034_v0 = vpop.f32.mrb[9].mxu0  ;;  %v238_v1 = vadd.f32 %v237_v60, %v236_v58  ;;  %v272_v3 = vmul.f32 %v2032_v62, %v2032_v62  ;;  %v241_v8 = vsel %vm223_vm1, %v2032_v62, 0.0 }
  0xe9   :  { %v239_v4 = vsel %vm223_vm1, %v2034_v0, 0.0  ;;  %v271_v5 = vmul.f32 %v2034_v0, %v2034_v0 }
  0xea   :  { %v240_v6 = vadd.f32 %v239_v4, %v238_v1  ;;  %v293_v7 = vadd.f32 %v292_v2, %v291_v63  ;;  %v296_v14 = vsel %vm223_vm1, %v272_v3, 0.0 }
  0xeb   :  { %v294_v9 = vsel %vm223_vm1, %v271_v5, 0.0  ;;  %v2046_v10 = vpop.f32.mrb[10].mxu0 }
  0xec   :  { %v295_v11 = vadd.f32 %v294_v9, %v293_v7  ;;  %v2048_v12 = vpop.f32.mrb[11].mxu0  ;;  %v242_v13 = vadd.f32 %v241_v8, %v240_v6  ;;  %v274_v15 = vmul.f32 %v2046_v10, %v2046_v10  ;;  %v245_v21 = vsel %vm223_vm1, %v2046_v10, 0.0 }
  0xed   :  { %v243_v16 = vsel %vm223_vm1, %v2048_v12, 0.0  ;;  %v273_v17 = vmul.f32 %v2048_v12, %v2048_v12 }
  0xee   :  { %v244_v18 = vadd.f32 %v243_v16, %v242_v13  ;;  %v297_v19 = vadd.f32 %v296_v14, %v295_v11  ;;  %v300_v28 = vsel %vm223_vm1, %v274_v15, 0.0 }
  0xef   :  { %v298_v22 = vsel %vm223_vm1, %v273_v17, 0.0  ;;  %v2060_v24 = vpop.f32.mrb[12].mxu0 }
  0xf0   :  { %v299_v25 = vadd.f32 %v298_v22, %v297_v19  ;;  %v2062_v26 = vpop.f32.mrb[13].mxu0  ;;  %v246_v27 = vadd.f32 %v245_v21, %v244_v18  ;;  %v276_v30 = vmul.f32 %v2060_v24, %v2060_v24  ;;  %v249_v36 = vsel %vm223_vm1, %v2060_v24, 0.0 }
  0xf1   :  { %v247_v32 = vsel %vm223_vm1, %v2062_v26, 0.0  ;;  %v275_v33 = vmul.f32 %v2062_v26, %v2062_v26 }
  0xf2   :  { %v248_v34 = vadd.f32 %v247_v32, %v246_v27  ;;  %v301_v35 = vadd.f32 %v300_v28, %v299_v25  ;;  %v304_v44 = vsel %vm223_vm1, %v276_v30, 0.0 }
  0xf3   :  { %v302_v37 = vsel %vm223_vm1, %v275_v33, 0.0  ;;  %v2074_v39 = vpop.f32.mrb[14].mxu0 }
  0xf4   :  { %v303_v41 = vadd.f32 %v302_v37, %v301_v35  ;;  %v214_v42 = vpop.f32.mrb[15].mxu0  ;;  %v250_v43 = vadd.f32 %v249_v36, %v248_v34  ;;  %v278_v45 = vmul.f32 %v2074_v39, %v2074_v39  ;;  %v253_v51 = vsel %vm223_vm1, %v2074_v39, 0.0 }
  0xf5   :  { %v251_v46 = vsel %vm223_vm1, %v214_v42, 0.0  ;;  %v277_v47 = vmul.f32 %v214_v42, %v214_v42 }
  0xf6   :  { %v252_v48 = vadd.f32 %v251_v46, %v250_v43  ;;  %v305_v49 = vadd.f32 %v304_v44, %v303_v41  ;;  %v308_v56 = vsel %vm223_vm1, %v278_v45, 0.0 }
  0xf7   :  { %v306_v53 = vsel %vm223_vm1, %v277_v47, 0.0 }
  0xf8   :  { %v254_v54 = vadd.f32 %v253_v51, %v252_v48  ;;  %v307_v55 = vadd.f32 %v306_v53, %v305_v49 }
  0xfa   :  { %v255_v57 = vrot.slane %v254_v54, 4  ;;  %v309_v58 = vadd.f32 %v308_v56, %v307_v55 }
  0xfc   :  { %v256_v59 = vadd.f32 %v255_v57, %v254_v54  ;;  %v310_v60 = vrot.slane %v309_v58, 4 }
  0xfe   :  { %v257_v61 = vrot.slane %v256_v59, 2  ;;  %v311_v63 = vadd.f32 %v310_v60, %v309_v58 }
 0x100   :  { %v258_v1 = vadd.f32 %v257_v61, %v256_v59  ;;  %v312_v2 = vrot.slane %v311_v63, 2 }
 0x102   :  { %v259_v3 = vrot.slane %v258_v1, 1  ;;  %v313_v4 = vadd.f32 %v312_v2, %v311_v63 }
 0x104   :  { %v260_v5 = vadd.f32 %v259_v3, %v258_v1  ;;  %v314_v6 = vrot.slane %v313_v4, 1 }
 0x106   :  { %v262_v7 = vmul.f32 0.0078125, %v260_v5  ;;  %v315_v8 = vadd.f32 %v314_v6, %v313_v4 }
 0x108   :  { %v316_v9 = vmul.f32 0.0078125, %v315_v8  ;;  %v317_v11 = vmul.f32 %v262_v7, %v262_v7  ;;  %v335_v13 = vsub.f32 %v214_v42, %v262_v7  ;;  %v321_v14 = vsub.f32 %v1983_v23, %v262_v7 }
 0x109   :  { %v322_v15 = vsub.f32 %v1977_v20, %v262_v7  ;;  %v323_v16 = vsub.f32 %v1993_v31, %v262_v7  ;;  %v324_v17 = vsub.f32 %v1991_v29, %v262_v7  ;;  %v325_v18 = vsub.f32 %v2006_v40, %v262_v7 }
 0x10a   :  { %v318_v19 = vsub.f32 %v316_v9, %v317_v11  ;;  %v326_v21 = vsub.f32 %v2004_v38, %v262_v7  ;;  %v327_v22 = vsub.f32 %v2020_v52, %v262_v7  ;;  %v328_v25 = vsub.f32 %v2018_v50, %v262_v7  ;;  %v337_v50 = vld [vmem:[%s2581_s1 + $0x8] sm:$0x1] }
 0x10b   :  { %v329_v27 = vsub.f32 %v2034_v0, %v262_v7  ;;  %v330_v28 = vsub.f32 %v2032_v62, %v262_v7  ;;  %v331_v23 = vsub.f32 %v2048_v12, %v262_v7  ;;  %v332_v20 = vsub.f32 %v2046_v10, %v262_v7 }
 0x10c   :  { %v319_v31 = vadd.f32 1e-05, %v318_v19  ;;  %v333_v29 = vsub.f32 %v2062_v26, %v262_v7  ;;  %v334_v40 = vsub.f32 %v2060_v24, %v262_v7  ;;  %v336_v30 = vsub.f32 %v2074_v39, %v262_v7  ;;  %v1589_v26 = vld [vmem:[%s2581_s1 + $0x10] ss:$0 sm:$0xff] }
 0x10d   :  { %v339_v38 = vlaneseq }
 0x10e   :  { %1854 = vrsqrt.f32 %v319_v31 }
 0x10f   :  { %v340_v52 = vshrl.u32 %v339_v38, 7 }
 0x111   :  { %v2102_v0 = vsub.s32 0, %v340_v52 }
 0x118   :  { %v1855_v62 = vpop.eup %1854 }
 0x119   :  { %v338_v12 = vmul.f32 %v1855_v62, %v337_v50 }
 0x11b   :  { %v342_v10 = vrot.slane %v338_v12, %v2102_v0 }
 0x11d   :  { %v357_v24 = vmul.f32 %v342_v10, %v335_v13  ;;  %v343_v32 = vmul.f32 %v342_v10, %v321_v14  ;;  %v344_v33 = vmul.f32 %v342_v10, %v322_v15  ;;  %v345_v34 = vmul.f32 %v342_v10, %v323_v16 }
 0x11e   :  { %v346_v35 = vmul.f32 %v342_v10, %v324_v17  ;;  %v347_v36 = vmul.f32 %v342_v10, %v325_v18  ;;  %v348_v37 = vmul.f32 %v342_v10, %v326_v21  ;;  %v349_v39 = vmul.f32 %v342_v10, %v327_v22 }
 0x11f   :  { %v364_v41 = vadd.f32 %v1589_v26, %v343_v32  ;;  %v365_v42 = vadd.f32 %v1589_v26, %v344_v33  ;;  %v366_v43 = vadd.f32 %v1589_v26, %v345_v34  ;;  %v350_v46 = vmul.f32 %v342_v10, %v328_v25 }
 0x120   :  { %v367_v47 = vadd.f32 %v1589_v26, %v346_v35  ;;  %v368_v48 = vadd.f32 %v1589_v26, %v347_v36  ;;  %v351_v51 = vmul.f32 %v342_v10, %v329_v27  ;;  %v352_v53 = vmul.f32 %v342_v10, %v330_v28  ;;  %v762_v27 = vld [vmem:[%s2581_s1 + $0x38] sm:$0xff]  ;;  %v763_v28 = vld [vmem:[%s2581_s1 + $0x40] sm:$0xff] }
 0x121   :  { %v380_v44 = vmax.f32 %v364_v41, 0.0  ;;  %v381_v45 = vmax.f32 %v365_v42, 0.0  ;;  %v382_v49 = vmax.f32 %v366_v43, 0.0  ;;  %v353_v54 = vmul.f32 %v342_v10, %v331_v23 }
 0x122   :  { %v354_v55 = vmul.f32 %v342_v10, %v332_v20  ;;  %v355_v56 = vmul.f32 %v342_v10, %v333_v29  ;;  %v356_v57 = vmul.f32 %v342_v10, %v334_v40  ;;  %v383_v58 = vmax.f32 %v367_v47, 0.0 }
 0x123   :  { %1745 = vmatprep.mubr.msk.f32.mxu1 %vm223_vm1, %v380_v44  ;;  %v369_v59 = vadd.f32 %v1589_v26, %v348_v37  ;;  %v358_v60 = vmul.f32 %v342_v10, %v336_v30  ;;  %v384_v61 = vmax.f32 %v368_v48, 0.0  ;;  %v370_v63 = vadd.f32 %v1589_v26, %v349_v39 }
 0x124   :  { %1746 = vmatmul.mubr.msk.f32.vlgmr.msra.gmra.mrb[0].mxu1 %vm223_vm1, %v381_v45  ;;  %v371_v2 = vadd.f32 %v1589_v26, %v350_v46  ;;  %v372_v4 = vadd.f32 %v1589_v26, %v351_v51  ;;  %v373_v6 = vadd.f32 %v1589_v26, %v352_v53  ;;  %v374_v8 = vadd.f32 %v1589_v26, %v353_v54 }
 0x125   :  { %1748 = vmatprep.mubr.msk.f32.mxu1 %vm223_vm1, %v382_v49  ;;  %v385_v1 = vmax.f32 %v369_v59, 0.0  ;;  %v386_v3 = vmax.f32 %v370_v63, 0.0  ;;  %v375_v11 = vadd.f32 %v1589_v26, %v354_v55  ;;  %v376_v14 = vadd.f32 %v1589_v26, %v355_v56 }
 0x126   :  { %v387_v5 = vmax.f32 %v371_v2, 0.0  ;;  %v388_v7 = vmax.f32 %v372_v4, 0.0  ;;  %v389_v9 = vmax.f32 %v373_v6, 0.0  ;;  %v390_v13 = vmax.f32 %v374_v8, 0.0 }
 0x127   :  { %v391_v15 = vmax.f32 %v375_v11, 0.0  ;;  %v377_v16 = vadd.f32 %v1589_v26, %v356_v57  ;;  %v378_v17 = vadd.f32 %v1589_v26, %v357_v24  ;;  %v392_v18 = vmax.f32 %v376_v14, 0.0 }
 0x128   :  { %1749 = vmatmul.mubr.msk.f32.gmra.mrb[2].mxu1 %vm223_vm1, %v383_v58  ;;  %v379_v21 = vadd.f32 %v1589_v26, %v358_v60  ;;  %v1833_v23 = vpack.c.bf16 %v763_v28, %v762_v27 }
 0x129   :  { %1751 = vmatprep.mubr.msk.f32.mxu1 %vm223_vm1, %v384_v61  ;;  %v393_v19 = vmax.f32 %v377_v16, 0.0  ;;  %v394_v22 = vmax.f32 %v378_v17, 0.0 }
 0x12a   :  { %v395_v25 = vmax.f32 %v379_v21, 0.0  ;;  %1834 = vmatprep.subr.bf16.mxu0 %v1833_v23 }
 0x12b   :  { %1836 = vmatpush3.bf16.msra.mxu0 %v1833_v23 }
 0x12c   :  { %1752 = vmatmul.mubr.msk.f32.gmra.mrb[4].mxu1 %vm223_vm1, %v385_v1 }
 0x12d   :  { %1754 = vmatprep.mubr.msk.f32.mxu1 %vm223_vm1, %v386_v3 }
 0x130   :  { %1755 = vmatmul.mubr.msk.f32.gmra.mrb[6].mxu1 %vm223_vm1, %v387_v5 }
 0x131   :  { %1757 = vmatprep.mubr.msk.f32.mxu1 %vm223_vm1, %v388_v7 }
 0x134   :  { %1758 = vmatmul.mubr.msk.f32.gmra.mrb[8].mxu1 %vm223_vm1, %v389_v9 }
 0x135   :  { %1760 = vmatprep.mubr.msk.f32.mxu1 %vm223_vm1, %v390_v13 }
 0x138   :  { %1761 = vmatmul.mubr.msk.f32.gmra.mrb[10].mxu1 %vm223_vm1, %v391_v15 }
 0x139   :  { %1763 = vmatprep.mubr.msk.f32.mxu1 %vm223_vm1, %v392_v18 }
 0x13c   :  { %1764 = vmatmul.mubr.msk.f32.gmra.mrb[12].mxu1 %vm223_vm1, %v393_v19 }
 0x13d   :  { %1766 = vmatprep.mubr.msk.f32.mxu1 %vm223_vm1, %v394_v22 }
 0x140   :  { %1767 = vmatmul.mubr.msk.f32.gmra.mrb[14].mxu1 %vm223_vm1, %v395_v25 }
 0x1f7   :  { %v2130_v20 = vpop.f32.mrb[0].mxu1 }
 0x1f8   :  { %v592_v31 = vsel %vm223_vm1, %v2130_v20, 0.0  ;;  %v630_v29 = vmul.f32 %v2130_v20, %v2130_v20  ;;  %v2136_v40 = vpop.f32.mrb[1].mxu1 }
 0x1f9   :  { %v591_v30 = vsel %vm223_vm1, %v2136_v40, 0.0  ;;  %v629_v38 = vmul.f32 %v2136_v40, %v2136_v40 }
 0x1fa   :  { %v646_v52 = vsel %vm223_vm1, %v630_v29, 0.0  ;;  %v593_v50 = vadd.f32 %v592_v31, %v591_v30 }
 0x1fb   :  { %v645_v62 = vsel %vm223_vm1, %v629_v38, 0.0  ;;  %v2144_v12 = vpop.f32.mrb[2].mxu1 }
 0x1fc   :  { %v647_v10 = vadd.f32 %v646_v52, %v645_v62  ;;  %v2146_v26 = vpop.f32.mrb[3].mxu1  ;;  %v632_v24 = vmul.f32 %v2144_v12, %v2144_v12  ;;  %v596_v35 = vsel %vm223_vm1, %v2144_v12, 0.0 }
 0x1fd   :  { %v594_v32 = vsel %vm223_vm1, %v2146_v26, 0.0  ;;  %v631_v33 = vmul.f32 %v2146_v26, %v2146_v26 }
 0x1fe   :  { %v595_v34 = vadd.f32 %v594_v32, %v593_v50  ;;  %v650_v43 = vsel %vm223_vm1, %v632_v24, 0.0 }
 0x1ff   :  { %v648_v36 = vsel %vm223_vm1, %v631_v33, 0.0  ;;  %v2157_v37 = vpop.f32.mrb[4].mxu1 }
 0x200   :  { %v649_v39 = vadd.f32 %v648_v36, %v647_v10  ;;  %v2159_v41 = vpop.f32.mrb[5].mxu1  ;;  %v597_v42 = vadd.f32 %v596_v35, %v595_v34  ;;  %v634_v44 = vmul.f32 %v2157_v37, %v2157_v37  ;;  %v600_v49 = vsel %vm223_vm1, %v2157_v37, 0.0 }
 0x201   :  { %v598_v45 = vsel %vm223_vm1, %v2159_v41, 0.0  ;;  %v633_v46 = vmul.f32 %v2159_v41, %v2159_v41 }
 0x202   :  { %v599_v47 = vadd.f32 %v598_v45, %v597_v42  ;;  %v651_v48 = vadd.f32 %v650_v43, %v649_v39  ;;  %v654_v57 = vsel %vm223_vm1, %v634_v44, 0.0 }
 0x203   :  { %v652_v51 = vsel %vm223_vm1, %v633_v46, 0.0  ;;  %v2171_v53 = vpop.f32.mrb[6].mxu1 }
 0x204   :  { %v653_v54 = vadd.f32 %v652_v51, %v651_v48  ;;  %v2173_v55 = vpop.f32.mrb[7].mxu1  ;;  %v601_v56 = vadd.f32 %v600_v49, %v599_v47  ;;  %v636_v58 = vmul.f32 %v2171_v53, %v2171_v53  ;;  %v604_v1 = vsel %vm223_vm1, %v2171_v53, 0.0 }
 0x205   :  { %v602_v59 = vsel %vm223_vm1, %v2173_v55, 0.0  ;;  %v635_v60 = vmul.f32 %v2173_v55, %v2173_v55 }
 0x206   :  { %v603_v61 = vadd.f32 %v602_v59, %v601_v56  ;;  %v655_v63 = vadd.f32 %v654_v57, %v653_v54  ;;  %v658_v7 = vsel %vm223_vm1, %v636_v58, 0.0 }
 0x207   :  { %v656_v2 = vsel %vm223_vm1, %v635_v60, 0.0  ;;  %v2185_v3 = vpop.f32.mrb[8].mxu1 }
 0x208   :  { %v657_v4 = vadd.f32 %v656_v2, %v655_v63  ;;  %v2187_v5 = vpop.f32.mrb[9].mxu1  ;;  %v605_v6 = vadd.f32 %v604_v1, %v603_v61  ;;  %v638_v8 = vmul.f32 %v2185_v3, %v2185_v3  ;;  %v608_v15 = vsel %vm223_vm1, %v2185_v3, 0.0 }
 0x209   :  { %v606_v9 = vsel %vm223_vm1, %v2187_v5, 0.0  ;;  %v637_v11 = vmul.f32 %v2187_v5, %v2187_v5 }
 0x20a   :  { %v607_v13 = vadd.f32 %v606_v9, %v605_v6  ;;  %v659_v14 = vadd.f32 %v658_v7, %v657_v4  ;;  %v662_v22 = vsel %vm223_vm1, %v638_v8, 0.0 }
 0x20b   :  { %v660_v16 = vsel %vm223_vm1, %v637_v11, 0.0  ;;  %v2199_v17 = vpop.f32.mrb[10].mxu1 }
 0x20c   :  { %v661_v18 = vadd.f32 %v660_v16, %v659_v14  ;;  %v2201_v19 = vpop.f32.mrb[11].mxu1  ;;  %v609_v21 = vadd.f32 %v608_v15, %v607_v13  ;;  %v640_v25 = vmul.f32 %v2199_v17, %v2199_v17  ;;  %v612_v29 = vsel %vm223_vm1, %v2199_v17, 0.0 }
 0x20d   :  { %v610_v27 = vsel %vm223_vm1, %v2201_v19, 0.0  ;;  %v639_v28 = vmul.f32 %v2201_v19, %v2201_v19 }
 0x20e   :  { %v611_v23 = vadd.f32 %v610_v27, %v609_v21  ;;  %v663_v31 = vadd.f32 %v662_v22, %v661_v18  ;;  %v666_v10 = vsel %vm223_vm1, %v640_v25, 0.0 }
 0x20f   :  { %v664_v30 = vsel %vm223_vm1, %v639_v28, 0.0  ;;  %v2213_v38 = vpop.f32.mrb[12].mxu1 }
 0x210   :  { %v665_v52 = vadd.f32 %v664_v30, %v663_v31  ;;  %v2215_v50 = vpop.f32.mrb[13].mxu1  ;;  %v613_v62 = vadd.f32 %v612_v29, %v611_v23  ;;  %v642_v24 = vmul.f32 %v2213_v38, %v2213_v38  ;;  %v616_v36 = vsel %vm223_vm1, %v2213_v38, 0.0 }
 0x211   :  { %v614_v32 = vsel %vm223_vm1, %v2215_v50, 0.0  ;;  %v641_v33 = vmul.f32 %v2215_v50, %v2215_v50 }
 0x212   :  { %v615_v34 = vadd.f32 %v614_v32, %v613_v62  ;;  %v667_v35 = vadd.f32 %v666_v10, %v665_v52  ;;  %v670_v46 = vsel %vm223_vm1, %v642_v24, 0.0 }
 0x213   :  { %v668_v39 = vsel %vm223_vm1, %v641_v33, 0.0  ;;  %v2227_v42 = vpop.f32.mrb[14].mxu1 }
 0x214   :  { %v669_v43 = vadd.f32 %v668_v39, %v667_v35  ;;  %v582_v44 = vpop.f32.mrb[15].mxu1  ;;  %v617_v45 = vadd.f32 %v616_v36, %v615_v34  ;;  %v644_v47 = vmul.f32 %v2227_v42, %v2227_v42  ;;  %v620_v56 = vsel %vm223_vm1, %v2227_v42, 0.0 }
 0x215   :  { %v618_v48 = vsel %vm223_vm1, %v582_v44, 0.0  ;;  %v643_v49 = vmul.f32 %v582_v44, %v582_v44 }
 0x216   :  { %v619_v51 = vadd.f32 %v618_v48, %v617_v45  ;;  %v671_v54 = vadd.f32 %v670_v46, %v669_v43  ;;  %v674_v60 = vsel %vm223_vm1, %v644_v47, 0.0 }
 0x217   :  { %v672_v57 = vsel %vm223_vm1, %v643_v49, 0.0 }
 0x218   :  { %v621_v58 = vadd.f32 %v620_v56, %v619_v51  ;;  %v673_v59 = vadd.f32 %v672_v57, %v671_v54 }
 0x21a   :  { %v622_v61 = vrot.slane %v621_v58, 4  ;;  %v675_v63 = vadd.f32 %v674_v60, %v673_v59 }
 0x21c   :  { %v623_v1 = vadd.f32 %v622_v61, %v621_v58  ;;  %v676_v2 = vrot.slane %v675_v63, 4 }
 0x21e   :  { %v624_v4 = vrot.slane %v623_v1, 2  ;;  %v677_v6 = vadd.f32 %v676_v2, %v675_v63 }
 0x220   :  { %v625_v7 = vadd.f32 %v624_v4, %v623_v1  ;;  %v678_v8 = vrot.slane %v677_v6, 2 }
 0x222   :  { %v626_v9 = vrot.slane %v625_v7, 1  ;;  %v679_v11 = vadd.f32 %v678_v8, %v677_v6 }
 0x224   :  { %v627_v13 = vadd.f32 %v626_v9, %v625_v7  ;;  %v680_v14 = vrot.slane %v679_v11, 1 }
 0x226   :  { %v628_v15 = vmul.f32 0.0078125, %v627_v13  ;;  %v681_v16 = vadd.f32 %v680_v14, %v679_v11 }
 0x228   :  { %v682_v18 = vmul.f32 0.0078125, %v681_v16  ;;  %v683_v21 = vmul.f32 %v628_v15, %v628_v15  ;;  %v701_v22 = vsub.f32 %v582_v44, %v628_v15  ;;  %v687_v25 = vsub.f32 %v2136_v40, %v628_v15 }
 0x229   :  { %v688_v27 = vsub.f32 %v2130_v20, %v628_v15  ;;  %v689_v28 = vsub.f32 %v2146_v26, %v628_v15  ;;  %v690_v23 = vsub.f32 %v2144_v12, %v628_v15  ;;  %v691_v31 = vsub.f32 %v2159_v41, %v628_v15 }
 0x22a   :  { %v684_v29 = vsub.f32 %v682_v18, %v683_v21  ;;  %v692_v30 = vsub.f32 %v2157_v37, %v628_v15  ;;  %v693_v52 = vsub.f32 %v2173_v55, %v628_v15  ;;  %v694_v62 = vsub.f32 %v2171_v53, %v628_v15  ;;  %v703_v37 = vld [vmem:[%s2581_s1 + $0x28] sm:$0x1] }
 0x22b   :  { %v695_v10 = vsub.f32 %v2187_v5, %v628_v15  ;;  %v696_v24 = vsub.f32 %v2185_v3, %v628_v15  ;;  %v697_v40 = vsub.f32 %v2201_v19, %v628_v15  ;;  %v698_v20 = vsub.f32 %v2199_v17, %v628_v15  ;;  %v1606_v5 = vld [vmem:[%s2581_s1 + $0x30] ss:$0 sm:$0xff] }
 0x22c   :  { %v685_v26 = vadd.f32 1e-05, %v684_v29  ;;  %v699_v12 = vsub.f32 %v2215_v50, %v628_v15  ;;  %v700_v41 = vsub.f32 %v2213_v38, %v628_v15  ;;  %v702_v32 = vsub.f32 %v2227_v42, %v628_v15 }
 0x22e   :  { %1856 = vrsqrt.f32 %v685_v26  ;;  %v2290_v26 = vld [vmem:[%s2581_s1 + $0x48] ss:$0 sm:$0xff] }
 0x238   :  { %v1857_v53 = vpop.eup %1856 }
 0x239   :  { %v704_v55 = vmul.f32 %v1857_v53, %v703_v37 }
 0x23b   :  { %v708_v3 = vrot.slane %v704_v55, %v2102_v0 }
 0x23d   :  { %v723_v17 = vmul.f32 %v708_v3, %v701_v22  ;;  %v709_v19 = vmul.f32 %v708_v3, %v687_v25  ;;  %v710_v50 = vmul.f32 %v708_v3, %v688_v27  ;;  %v711_v33 = vmul.f32 %v708_v3, %v689_v28 }
 0x23e   :  { %v712_v38 = vmul.f32 %v708_v3, %v690_v23  ;;  %v713_v34 = vmul.f32 %v708_v3, %v691_v31  ;;  %v714_v35 = vmul.f32 %v708_v3, %v692_v30  ;;  %v715_v36 = vmul.f32 %v708_v3, %v693_v52  ;;  %v1134_v52 = vld [vmem:[%s2581_s1 + $0x60] sm:$0xff] }
 0x23f   :  { %v730_v39 = vadd.f32 %v1606_v5, %v709_v19  ;;  %v731_v42 = vadd.f32 %v1606_v5, %v710_v50  ;;  %v732_v43 = vadd.f32 %v1606_v5, %v711_v33  ;;  %v716_v46 = vmul.f32 %v708_v3, %v694_v62  ;;  %v1135_v62 = vld [vmem:[%s2581_s1 + $0x68] sm:$0xff] }
 0x240   :  { %v733_v47 = vadd.f32 %v1606_v5, %v712_v38  ;;  %v734_v48 = vadd.f32 %v1606_v5, %v713_v34  ;;  %v717_v51 = vmul.f32 %v708_v3, %v695_v10  ;;  %v718_v54 = vmul.f32 %v708_v3, %v696_v24  ;;  %v1136_v10 = vld [vmem:[%s2581_s1 + $0x70] sm:$0xff] }
 0x241   :  { %v746_v44 = vmax.f32 %v730_v39, 0.0  ;;  %v747_v45 = vmax.f32 %v731_v42, 0.0  ;;  %v748_v49 = vmax.f32 %v732_v43, 0.0  ;;  %v719_v56 = vmul.f32 %v708_v3, %v697_v40  ;;  %v1137_v40 = vld [vmem:[%s2581_s1 + $0x78] sm:$0xff] }
 0x242   :  { %v720_v57 = vmul.f32 %v708_v3, %v698_v20  ;;  %v721_v58 = vmul.f32 %v708_v3, %v699_v12  ;;  %v722_v59 = vmul.f32 %v708_v3, %v700_v41  ;;  %v749_v60 = vmax.f32 %v733_v47, 0.0 }
 0x243   :  { %1773 = vmatprep.mubr.msk.f32.mxu0 %vm223_vm1, %v746_v44  ;;  %v735_v61 = vadd.f32 %v1606_v5, %v714_v35  ;;  %v724_v63 = vmul.f32 %v708_v3, %v702_v32  ;;  %v750_v1 = vmax.f32 %v734_v48, 0.0  ;;  %v736_v2 = vadd.f32 %v1606_v5, %v715_v36 }
 0x244   :  { %1774 = vmatmul.mubr.msk.f32.vlgmr.msra.gmra.mrb[16].mxu0 %vm223_vm1, %v747_v45  ;;  %v737_v6 = vadd.f32 %v1606_v5, %v716_v46  ;;  %v738_v8 = vadd.f32 %v1606_v5, %v717_v51  ;;  %v739_v11 = vadd.f32 %v1606_v5, %v718_v54  ;;  %v740_v14 = vadd.f32 %v1606_v5, %v719_v56 }
 0x245   :  { %1776 = vmatprep.mubr.msk.f32.mxu0 %vm223_vm1, %v748_v49  ;;  %v751_v4 = vmax.f32 %v735_v61, 0.0  ;;  %v752_v7 = vmax.f32 %v736_v2, 0.0  ;;  %v741_v16 = vadd.f32 %v1606_v5, %v720_v57  ;;  %v742_v21 = vadd.f32 %v1606_v5, %v721_v58 }
 0x246   :  { %v753_v9 = vmax.f32 %v737_v6, 0.0  ;;  %v754_v13 = vmax.f32 %v738_v8, 0.0  ;;  %v755_v15 = vmax.f32 %v739_v11, 0.0  ;;  %v756_v18 = vmax.f32 %v740_v14, 0.0 }
 0x247   :  { %v757_v22 = vmax.f32 %v741_v16, 0.0  ;;  %v743_v25 = vadd.f32 %v1606_v5, %v722_v59  ;;  %v744_v27 = vadd.f32 %v1606_v5, %v723_v17  ;;  %v758_v28 = vmax.f32 %v742_v21, 0.0 }
 0x248   :  { %1777 = vmatmul.mubr.msk.f32.gmra.mrb[18].mxu0 %vm223_vm1, %v749_v60  ;;  %v745_v31 = vadd.f32 %v1606_v5, %v724_v63  ;;  %v1837_v24 = vpack.c.bf16 %v1135_v62, %v1134_v52  ;;  %v1841_v20 = vpack.c.bf16 %v1137_v40, %v1136_v10 }
 0x249   :  { %1779 = vmatprep.mubr.msk.f32.mxu0 %vm223_vm1, %v750_v1  ;;  %v759_v23 = vmax.f32 %v743_v25, 0.0  ;;  %v760_v29 = vmax.f32 %v744_v27, 0.0 }
 0x24a   :  { %v761_v30 = vmax.f32 %v745_v31, 0.0  ;;  %1838 = vmatprep.subr.bf16.mxu1 %v1837_v24 }
 0x24b   :  { %1840 = vmatpush3.bf16.msra.mxu1 %v1837_v24 }
 0x24c   :  { %1780 = vmatmul.mubr.msk.f32.gmra.mrb[20].mxu0 %vm223_vm1, %v751_v4  ;;  %1842 = vmatprep.subr.bf16.mxu1 %v1841_v20 }
 0x24d   :  { %1782 = vmatprep.mubr.msk.f32.mxu0 %vm223_vm1, %v752_v7 }
 0x24f   :  { %1844 = vmatpush3.bf16.msra.mxu1 %v1841_v20 }
 0x250   :  { %1783 = vmatmul.mubr.msk.f32.gmra.mrb[22].mxu0 %vm223_vm1, %v753_v9 }
 0x251   :  { %1785 = vmatprep.mubr.msk.f32.mxu0 %vm223_vm1, %v754_v13 }
 0x254   :  { %1786 = vmatmul.mubr.msk.f32.gmra.mrb[24].mxu0 %vm223_vm1, %v755_v15 }
 0x255   :  { %1788 = vmatprep.mubr.msk.f32.mxu0 %vm223_vm1, %v756_v18 }
 0x258   :  { %1789 = vmatmul.mubr.msk.f32.gmra.mrb[26].mxu0 %vm223_vm1, %v757_v22 }
 0x259   :  { %1791 = vmatprep.mubr.msk.f32.mxu0 %vm223_vm1, %v758_v28 }
 0x25c   :  { %1792 = vmatmul.mubr.msk.f32.gmra.mrb[28].mxu0 %vm223_vm1, %v759_v23 }
 0x25d   :  { %1794 = vmatprep.mubr.msk.f32.mxu0 %vm223_vm1, %v760_v29 }
 0x260   :  { %1795 = vmatmul.mubr.msk.f32.gmra.mrb[30].mxu0 %vm223_vm1, %v761_v30 }
 0x317   :  { %v1775_v12 = vpop.f32.mrb[16].mxu0 }
 0x318   :  { %v889_v41 = vadd.f32 %v1775_v12, %v2290_v26  ;;  %v883_v32 = vpop.f32.mrb[17].mxu0 }
 0x319   :  { %v884_v37 = vadd.f32 %v2290_v26, %v883_v32 }
 0x31a   :  { %v2294_v53 = vmax.f32 %v889_v41, 0.0 }
 0x31b   :  { %v2296_v55 = vmax.f32 %v884_v37, 0.0  ;;  %v1778_v3 = vpop.f32.mrb[18].mxu0 }
 0x31c   :  { %v980_v5 = vsel %vm978_vm2, %v2294_v53, 0.0  ;;  %v1018_v17 = vmul.f32 %v2294_v53, %v2294_v53  ;;  %v899_v19 = vadd.f32 %v1778_v3, %v2290_v26  ;;  %v893_v50 = vpop.f32.mrb[19].mxu0 }
 0x31d   :  { %v979_v33 = vsel %vm978_vm2, %v2296_v55, 0.0  ;;  %v1017_v38 = vmul.f32 %v2296_v55, %v2296_v55  ;;  %v894_v34 = vadd.f32 %v2290_v26, %v893_v50 }
 0x31e   :  { %v1034_v35 = vsel %vm978_vm2, %v1018_v17, 0.0  ;;  %v981_v36 = vadd.f32 %v980_v5, %v979_v33  ;;  %v2309_v39 = vmax.f32 %v899_v19, 0.0 }
 0x31f   :  { %v1033_v42 = vsel %vm978_vm2, %v1017_v38, 0.0  ;;  %v2312_v43 = vmax.f32 %v894_v34, 0.0  ;;  %v1781_v44 = vpop.f32.mrb[20].mxu0 }
 0x320   :  { %v1035_v45 = vadd.f32 %v1034_v35, %v1033_v42  ;;  %v1020_v46 = vmul.f32 %v2309_v39, %v2309_v39  ;;  %v909_v47 = vadd.f32 %v1781_v44, %v2290_v26  ;;  %v903_v48 = vpop.f32.mrb[21].mxu0  ;;  %v984_v58 = vsel %vm978_vm2, %v2309_v39, 0.0 }
 0x321   :  { %v982_v49 = vsel %vm978_vm2, %v2312_v43, 0.0  ;;  %v1019_v51 = vmul.f32 %v2312_v43, %v2312_v43  ;;  %v904_v54 = vadd.f32 %v2290_v26, %v903_v48 }
 0x322   :  { %v983_v56 = vadd.f32 %v982_v49, %v981_v36  ;;  %v2322_v57 = vmax.f32 %v909_v47, 0.0  ;;  %v1038_v63 = vsel %vm978_vm2, %v1020_v46, 0.0 }
 0x323   :  { %v1036_v59 = vsel %vm978_vm2, %v1019_v51, 0.0  ;;  %v2327_v60 = vmax.f32 %v904_v54, 0.0  ;;  %v1784_v61 = vpop.f32.mrb[22].mxu0 }
 0x324   :  { %v1037_v1 = vadd.f32 %v1036_v59, %v1035_v45  ;;  %v1022_v2 = vmul.f32 %v2322_v57, %v2322_v57  ;;  %v985_v4 = vadd.f32 %v984_v58, %v983_v56  ;;  %v913_v6 = vpop.f32.mrb[23].mxu0  ;;  %v919_v9 = vadd.f32 %v1784_v61, %v2290_v26 }
 0x325   :  { %v986_v7 = vsel %vm978_vm2, %v2327_v60, 0.0  ;;  %v1021_v8 = vmul.f32 %v2327_v60, %v2327_v60  ;;  %v914_v11 = vadd.f32 %v2290_v26, %v913_v6  ;;  %v988_v15 = vsel %vm978_vm2, %v2322_v57, 0.0 }
 0x326   :  { %v987_v13 = vadd.f32 %v986_v7, %v985_v4  ;;  %v1039_v14 = vadd.f32 %v1038_v63, %v1037_v1  ;;  %v2341_v18 = vmax.f32 %v919_v9, 0.0  ;;  %v1042_v31 = vsel %vm978_vm2, %v1022_v2, 0.0 }
 0x327   :  { %v1040_v16 = vsel %vm978_vm2, %v1021_v8, 0.0  ;;  %v2343_v21 = vmax.f32 %v914_v11, 0.0  ;;  %v1787_v22 = vpop.f32.mrb[24].mxu0 }
 0x328   :  { %v1041_v25 = vadd.f32 %v1040_v16, %v1039_v14  ;;  %v989_v27 = vadd.f32 %v988_v15, %v987_v13  ;;  %v929_v28 = vadd.f32 %v1787_v22, %v2290_v26  ;;  %v923_v23 = vpop.f32.mrb[25].mxu0  ;;  %v1024_v29 = vmul.f32 %v2341_v18, %v2341_v18 }
 0x329   :  { %v990_v30 = vsel %vm978_vm2, %v2343_v21, 0.0  ;;  %v1023_v52 = vmul.f32 %v2343_v21, %v2343_v21  ;;  %v924_v40 = vadd.f32 %v2290_v26, %v923_v23  ;;  %v992_v41 = vsel %vm978_vm2, %v2341_v18, 0.0 }
 0x32a   :  { %v991_v62 = vadd.f32 %v990_v30, %v989_v27  ;;  %v1043_v10 = vadd.f32 %v1042_v31, %v1041_v25  ;;  %v2353_v24 = vmax.f32 %v929_v28, 0.0  ;;  %v1046_v32 = vsel %vm978_vm2, %v1024_v29, 0.0 }
 0x32b   :  { %v1044_v20 = vsel %vm978_vm2, %v1023_v52, 0.0  ;;  %v1790_v12 = vpop.f32.mrb[26].mxu0  ;;  %v2360_v3 = vmax.f32 %v924_v40, 0.0 }
 0x32c   :  { %v1045_v37 = vadd.f32 %v1044_v20, %v1043_v10  ;;  %v933_v5 = vpop.f32.mrb[27].mxu0  ;;  %v1026_v17 = vmul.f32 %v2353_v24, %v2353_v24  ;;  %v993_v19 = vadd.f32 %v992_v41, %v991_v62  ;;  %v939_v50 = vadd.f32 %v1790_v12, %v2290_v26 }
 0x32d   :  { %v934_v33 = vadd.f32 %v2290_v26, %v933_v5  ;;  %v994_v38 = vsel %vm978_vm2, %v2360_v3, 0.0  ;;  %v1025_v34 = vmul.f32 %v2360_v3, %v2360_v3  ;;  %v996_v46 = vsel %vm978_vm2, %v2353_v24, 0.0 }
 0x32e   :  { %v1047_v35 = vadd.f32 %v1046_v32, %v1045_v37  ;;  %v995_v36 = vadd.f32 %v994_v38, %v993_v19  ;;  %v2370_v42 = vmax.f32 %v939_v50, 0.0  ;;  %v1050_v51 = vsel %vm978_vm2, %v1026_v17, 0.0 }
 0x32f   :  { %v2372_v44 = vmax.f32 %v934_v33, 0.0  ;;  %v1793_v45 = vpop.f32.mrb[28].mxu0  ;;  %v1048_v47 = vsel %vm978_vm2, %v1025_v34, 0.0 }
 0x330   :  { %v949_v48 = vadd.f32 %v1793_v45, %v2290_v26  ;;  %v943_v49 = vpop.f32.mrb[29].mxu0  ;;  %v1049_v54 = vadd.f32 %v1048_v47, %v1047_v35  ;;  %v1028_v56 = vmul.f32 %v2370_v42, %v2370_v42  ;;  %v997_v58 = vadd.f32 %v996_v46, %v995_v36 }
 0x331   :  { %v998_v59 = vsel %vm978_vm2, %v2372_v44, 0.0  ;;  %v1027_v61 = vmul.f32 %v2372_v44, %v2372_v44  ;;  %v944_v1 = vadd.f32 %v2290_v26, %v943_v49  ;;  %v1000_v7 = vsel %vm978_vm2, %v2370_v42, 0.0 }
 0x332   :  { %v2385_v63 = vmax.f32 %v949_v48, 0.0  ;;  %v999_v2 = vadd.f32 %v998_v59, %v997_v58  ;;  %v1051_v4 = vadd.f32 %v1050_v51, %v1049_v54  ;;  %v1054_v22 = vsel %vm978_vm2, %v1028_v56, 0.0 }
 0x333   :  { %v1796_v6 = vpop.f32.mrb[30].mxu0  ;;  %v1052_v8 = vsel %vm978_vm2, %v1027_v61, 0.0  ;;  %v2391_v9 = vmax.f32 %v944_v1, 0.0 }
 0x334   :  { %v953_v11 = vpop.f32.mrb[31].mxu0  ;;  %v1053_v13 = vadd.f32 %v1052_v8, %v1051_v4  ;;  %v1001_v14 = vadd.f32 %v1000_v7, %v999_v2  ;;  %v959_v15 = vadd.f32 %v1796_v6, %v2290_v26  ;;  %v1030_v25 = vmul.f32 %v2385_v63, %v2385_v63 }
 0x335   :  { %v954_v16 = vadd.f32 %v2290_v26, %v953_v11  ;;  %v1002_v27 = vsel %vm978_vm2, %v2391_v9, 0.0  ;;  %v1029_v28 = vmul.f32 %v2391_v9, %v2391_v9  ;;  %v1004_v52 = vsel %vm978_vm2, %v2385_v63, 0.0 }
 0x336   :  { %v1003_v23 = vadd.f32 %v1002_v27, %v1001_v14  ;;  %v1055_v31 = vadd.f32 %v1054_v22, %v1053_v13  ;;  %v2402_v29 = vmax.f32 %v959_v15, 0.0  ;;  %v1058_v40 = vsel %vm978_vm2, %v1030_v25, 0.0 }
 0x337   :  { %v976_v30 = vmax.f32 %v954_v16, 0.0  ;;  %v1056_v26 = vsel %vm978_vm2, %v1029_v28, 0.0 }
 0x338   :  { %v1057_v62 = vadd.f32 %v1056_v26, %v1055_v31  ;;  %v1005_v10 = vadd.f32 %v1004_v52, %v1003_v23  ;;  %v1032_v20 = vmul.f32 %v2402_v29, %v2402_v29  ;;  %v1008_v5 = vsel %vm978_vm2, %v2402_v29, 0.0 }
 0x339   :  { %v1006_v12 = vsel %vm978_vm2, %v976_v30, 0.0  ;;  %v1031_v41 = vmul.f32 %v976_v30, %v976_v30 }
 0x33a   :  { %v1007_v32 = vadd.f32 %v1006_v12, %v1005_v10  ;;  %v1059_v37 = vadd.f32 %v1058_v40, %v1057_v62  ;;  %v1062_v33 = vsel %vm978_vm2, %v1032_v20, 0.0 }
 0x33b   :  { %v1060_v17 = vsel %vm978_vm2, %v1031_v41, 0.0 }
 0x33c   :  { %v1009_v19 = vadd.f32 %v1008_v5, %v1007_v32  ;;  %v1061_v50 = vadd.f32 %v1060_v17, %v1059_v37 }
 0x33e   :  { %v1010_v38 = vrot.slane %v1009_v19, 4  ;;  %v1063_v34 = vadd.f32 %v1062_v33, %v1061_v50 }
 0x340   :  { %v1011_v35 = vadd.f32 %v1010_v38, %v1009_v19  ;;  %v1064_v36 = vrot.slane %v1063_v34, 4 }
 0x342   :  { %v1012_v45 = vrot.slane %v1011_v35, 2  ;;  %v1065_v46 = vadd.f32 %v1064_v36, %v1063_v34 }
 0x344   :  { %v1013_v47 = vadd.f32 %v1012_v45, %v1011_v35  ;;  %v1066_v48 = vrot.slane %v1065_v46, 2 }
 0x346   :  { %v1014_v49 = vrot.slane %v1013_v47, 1  ;;  %v1067_v51 = vadd.f32 %v1066_v48, %v1065_v46  ;;  %v1884_v48 = vmov 0  }
 0x347   :  { %1852 = vset.pattern.permute.xlu1 %v1884_v48  ;;  %1853 = vset.pattern.permute.xlu0 %v1884_v48 }
 0x348   :  { %v1015_v54 = vadd.f32 %v1014_v49, %v1013_v47  ;;  %v1068_v56 = vrot.slane %v1067_v51, 1  ;;  %v1625_v49 = vld [vmem:[%s2581_s1 + $0x80] ss:$0 sm:$0xff] }
 0x34a   :  { %v1016_v58 = vmul.f32 0.0078125, %v1015_v54  ;;  %v1069_v59 = vadd.f32 %v1068_v56, %v1067_v51 }
 0x34c   :  { %v1070_v61 = vmul.f32 0.0078125, %v1069_v59  ;;  %v1071_v1 = vmul.f32 %v1016_v58, %v1016_v58  ;;  %v1089_v2 = vsub.f32 %v976_v30, %v1016_v58  ;;  %v1075_v4 = vsub.f32 %v2296_v55, %v1016_v58 }
 0x34d   :  { %v1076_v6 = vsub.f32 %v2294_v53, %v1016_v58  ;;  %v1077_v7 = vsub.f32 %v2312_v43, %v1016_v58  ;;  %v1078_v8 = vsub.f32 %v2309_v39, %v1016_v58  ;;  %v1079_v11 = vsub.f32 %v2327_v60, %v1016_v58 }
 0x34e   :  { %v1072_v13 = vsub.f32 %v1070_v61, %v1071_v1  ;;  %v1080_v14 = vsub.f32 %v2322_v57, %v1016_v58  ;;  %v1081_v15 = vsub.f32 %v2343_v21, %v1016_v58  ;;  %v1082_v16 = vsub.f32 %v2341_v18, %v1016_v58  ;;  %v1091_v57 = vld [vmem:[%s2581_s1 + $0x50] sm:$0x1] }
 0x34f   :  { %v1083_v22 = vsub.f32 %v2360_v3, %v1016_v58  ;;  %v1084_v25 = vsub.f32 %v2353_v24, %v1016_v58  ;;  %v1085_v55 = vsub.f32 %v2372_v44, %v1016_v58  ;;  %v1086_v53 = vsub.f32 %v2370_v42, %v1016_v58  ;;  %v1624_v3 = vld [vmem:[%s2581_s1 + $0x58] ss:$0 sm:$0xff] }
 0x350   :  { %v1073_v43 = vadd.f32 1e-05, %v1072_v13  ;;  %v1087_v39 = vsub.f32 %v2391_v9, %v1016_v58  ;;  %v1088_v60 = vsub.f32 %v2385_v63, %v1016_v58  ;;  %v1090_v27 = vsub.f32 %v2402_v29, %v1016_v58 }
 0x352   :  { %1858 = vrsqrt.f32 %v1073_v43 }
 0x35c   :  { %v1859_v18 = vpop.eup %1858 }
 0x35d   :  { %v1092_v21 = vmul.f32 %v1859_v18, %v1091_v57 }
 0x35f   :  { %v1096_v24 = vrot.slane %v1092_v21, %v2102_v0 }
 0x361   :  { %v1111_v42 = vmul.f32 %v1096_v24, %v1089_v2  ;;  %v1097_v44 = vmul.f32 %v1096_v24, %v1075_v4  ;;  %v1098_v9 = vmul.f32 %v1096_v24, %v1076_v6  ;;  %v1099_v28 = vmul.f32 %v1096_v24, %v1077_v7 }
 0x362   :  { %v1100_v63 = vmul.f32 %v1096_v24, %v1078_v8  ;;  %v1101_v23 = vmul.f32 %v1096_v24, %v1079_v11  ;;  %v1102_v31 = vmul.f32 %v1096_v24, %v1080_v14  ;;  %v1103_v29 = vmul.f32 %v1096_v24, %v1081_v15 }
 0x363   :  { %v1118_v30 = vadd.f32 %v1624_v3, %v1097_v44  ;;  %v1119_v52 = vadd.f32 %v1624_v3, %v1098_v9  ;;  %v1104_v26 = vmul.f32 %v1096_v24, %v1082_v16  ;;  %v1120_v62 = vadd.f32 %v1624_v3, %v1099_v28 }
 0x364   :  { %v1105_v10 = vmul.f32 %v1096_v24, %v1083_v22  ;;  %v1106_v0 = vmul.f32 %v1096_v24, %v1084_v25  ;;  %v1107_v40 = vmul.f32 %v1096_v24, %v1085_v55  ;;  %v1108_v20 = vmul.f32 %v1096_v24, %v1086_v53 }
 0x365   :  { %1805 = vmatprep.mubr.msk.f32.mxu1 %vm978_vm2, %v1118_v30  ;;  %v1109_v12 = vmul.f32 %v1096_v24, %v1087_v39  ;;  %v1110_v41 = vmul.f32 %v1096_v24, %v1088_v60  ;;  %v1112_v32 = vmul.f32 %v1096_v24, %v1090_v27  ;;  %v1121_v37 = vadd.f32 %v1624_v3, %v1100_v63 }
 0x366   :  { %1806 = vmatmul.mubr.msk.f32.vlgmr.msra.gmra.mrb[16].mxu1 %vm978_vm2, %v1119_v52  ;;  %v1122_v5 = vadd.f32 %v1624_v3, %v1101_v23  ;;  %v1123_v17 = vadd.f32 %v1624_v3, %v1102_v31  ;;  %v1124_v19 = vadd.f32 %v1624_v3, %v1103_v29  ;;  %v1125_v50 = vadd.f32 %v1624_v3, %v1104_v26 }
 0x367   :  { %1808 = vmatprep.mubr.msk.f32.mxu1 %vm978_vm2, %v1120_v62  ;;  %v1126_v33 = vadd.f32 %v1624_v3, %v1105_v10  ;;  %v1127_v38 = vadd.f32 %v1624_v3, %v1106_v0  ;;  %v1128_v34 = vadd.f32 %v1624_v3, %v1107_v40  ;;  %v1129_v35 = vadd.f32 %v1624_v3, %v1108_v20 }
 0x368   :  { %v1130_v36 = vadd.f32 %v1624_v3, %v1109_v12  ;;  %v1131_v45 = vadd.f32 %v1624_v3, %v1110_v41  ;;  %v1132_v46 = vadd.f32 %v1624_v3, %v1111_v42  ;;  %v1133_v47 = vadd.f32 %v1624_v3, %v1112_v32 }
 0x36a   :  { %1809 = vmatmul.mubr.msk.f32.gmra.mrb[18].mxu1 %vm978_vm2, %v1121_v37 }
 0x36b   :  { %1811 = vmatprep.mubr.msk.f32.mxu1 %vm978_vm2, %v1122_v5 }
 0x36e   :  { %1812 = vmatmul.mubr.msk.f32.gmra.mrb[20].mxu1 %vm978_vm2, %v1123_v17 }
 0x36f   :  { %1814 = vmatprep.mubr.msk.f32.mxu1 %vm978_vm2, %v1124_v19 }
 0x372   :  { %1815 = vmatmul.mubr.msk.f32.gmra.mrb[22].mxu1 %vm978_vm2, %v1125_v50 }
 0x373   :  { %1817 = vmatprep.mubr.msk.f32.mxu1 %vm978_vm2, %v1126_v33 }
 0x376   :  { %1818 = vmatmul.mubr.msk.f32.gmra.mrb[24].mxu1 %vm978_vm2, %v1127_v38 }
 0x377   :  { %1820 = vmatprep.mubr.msk.f32.mxu1 %vm978_vm2, %v1128_v34 }
 0x37a   :  { %1821 = vmatmul.mubr.msk.f32.gmra.mrb[26].mxu1 %vm978_vm2, %v1129_v35 }
 0x37b   :  { %1823 = vmatprep.mubr.msk.f32.mxu1 %vm978_vm2, %v1130_v36 }
 0x37e   :  { %1824 = vmatmul.mubr.msk.f32.gmra.mrb[28].mxu1 %vm978_vm2, %v1131_v45 }
 0x37f   :  { %1826 = vmatprep.mubr.msk.f32.mxu1 %vm978_vm2, %v1132_v46 }
 0x382   :  { %1827 = vmatmul.mubr.msk.f32.gmra.mrb[30].mxu1 %vm978_vm2, %v1133_v47 }
 0x439   :  { %v1807_v51 = vpop.f32.mrb[16].mxu1 }
 0x43a   :  { %v1257_v54 = vpop.f32.mrb[17].mxu1  ;;  %v2460_v61 = vadd.f32 %v1807_v51, %v1625_v49 }
 0x43b   :  { %v2456_v56 = vadd.f32 %v1625_v49, %v1257_v54 }
 0x43d   :  { %v1810_v58 = vpop.f32.mrb[18].mxu1  ;;  %1352 = vrot.lane.b32.xlu0 %v2456_v56, %s1885_s18 }
 0x43e   :  { %v1267_v59 = vpop.f32.mrb[19].mxu1  ;;  %v2468_v6 = vadd.f32 %v1810_v58, %v1625_v49 }
 0x43f   :  { %v2462_v1 = vadd.f32 %v1625_v49, %v1267_v59 }
 0x441   :  { %v1813_v2 = vpop.f32.mrb[20].mxu1  ;;  %1356 = vrot.lane.b32.xlu1 %v2462_v1, %s1885_s18  ;;  %1354 = vrot.lane.b32.xlu0 %v2460_v61, %s1885_s18 }
 0x442   :  { %v1277_v4 = vpop.f32.mrb[21].mxu1  ;;  %v2476_v13 = vadd.f32 %v1813_v2, %v1625_v49 }
 0x443   :  { %v2470_v7 = vadd.f32 %v1625_v49, %v1277_v4 }
 0x445   :  { %v1816_v8 = vpop.f32.mrb[22].mxu1  ;;  %1358 = vrot.lane.b32.xlu1 %v2468_v6, %s1885_s18  ;;  %1360 = vrot.lane.b32.xlu0 %v2470_v7, %s1885_s18 }
 0x446   :  { %v1287_v11 = vpop.f32.mrb[23].mxu1  ;;  %v2484_v22 = vadd.f32 %v1816_v8, %v1625_v49 }
 0x447   :  { %v2478_v14 = vadd.f32 %v1625_v49, %v1287_v11 }
 0x449   :  { %v1819_v15 = vpop.f32.mrb[24].mxu1  ;;  %1362 = vrot.lane.b32.xlu1 %v2476_v13, %s1885_s18  ;;  %1364 = vrot.lane.b32.xlu0 %v2478_v14, %s1885_s18 }
 0x44a   :  { %v1297_v16 = vpop.f32.mrb[25].mxu1  ;;  %v2492_v43 = vadd.f32 %v1819_v15, %v1625_v49 }
 0x44b   :  { %v2486_v25 = vadd.f32 %v1625_v49, %v1297_v16 }
 0x44d   :  { %v1822_v55 = vpop.f32.mrb[26].mxu1  ;;  %1366 = vrot.lane.b32.xlu1 %v2484_v22, %s1885_s18  ;;  %1368 = vrot.lane.b32.xlu0 %v2486_v25, %s1885_s18 }
 0x44e   :  { %v1307_v53 = vpop.f32.mrb[27].mxu1  ;;  %v2500_v57 = vadd.f32 %v1822_v55, %v1625_v49 }
 0x44f   :  { %v2494_v39 = vadd.f32 %v1625_v49, %v1307_v53 }
 0x451   :  { %v1825_v60 = vpop.f32.mrb[28].mxu1  ;;  %1370 = vrot.lane.b32.xlu1 %v2492_v43, %s1885_s18  ;;  %1372 = vrot.lane.b32.xlu0 %v2494_v39, %s1885_s18 }
 0x452   :  { %v1317_v27 = vpop.f32.mrb[29].mxu1  ;;  %v2508_v3 = vadd.f32 %v1825_v60, %v1625_v49 }
 0x453   :  { %v2502_v18 = vadd.f32 %v1625_v49, %v1317_v27 }
 0x455   :  { %v1828_v21 = vpop.f32.mrb[30].mxu1  ;;  %1374 = vrot.lane.b32.xlu1 %v2500_v57, %s1885_s18  ;;  %1376 = vrot.lane.b32.xlu0 %v2502_v18, %s1885_s18 }
 0x456   :  { %v1327_v24 = vpop.f32.mrb[31].mxu1  ;;  %v2516_v44 = vadd.f32 %v1828_v21, %v1625_v49 }
 0x457   :  { %v2510_v42 = vadd.f32 %v1625_v49, %v1327_v24 }
 0x459   :  { %1378 = vrot.lane.b32.xlu1 %v2508_v3, %s1885_s18  ;;  %1380 = vrot.lane.b32.xlu0 %v2510_v42, %s1885_s18 }
 0x45d   :  { %1382 = vrot.lane.b32.xlu1 %v2516_v44, %s1885_s18 }
 0x461   :  { %1462 = vperm.xlu1 %1852, %v2456_v56  }
 0x465   :  { %1466 = vperm.xlu1 %1852, %v2460_v61  }
 0x469   :  { %1470 = vperm.xlu1 %1852, %v2462_v1  }
 0x46d   :  { %1474 = vperm.xlu1 %1852, %v2468_v6  }
 0x471   :  { %1478 = vperm.xlu1 %1852, %v2470_v7  }
 0x475   :  { %1482 = vperm.xlu1 %1852, %v2476_v13  }
 0x479   :  { %1486 = vperm.xlu1 %1852, %v2478_v14  }
 0x47d   :  { %1490 = vperm.xlu1 %1852, %v2484_v22  }
 0x481   :  { %1498 = vperm.xlu1 %1852, %v2492_v43  }
 0x485   :  { %1502 = vperm.xlu1 %1852, %v2494_v39  }
 0x489   :  { %1506 = vperm.xlu1 %1852, %v2500_v57  }
 0x48d   :  { %1510 = vperm.xlu1 %1852, %v2502_v18  }
 0x491   :  { %1514 = vperm.xlu1 %1852, %v2508_v3  }
 0x495   :  { %1518 = vperm.xlu1 %1852, %v2510_v42  }
 0x499   :  { %1522 = vperm.xlu1 %1852, %v2516_v44  }
 0x4af   :  { %v1353_v9 = vpop.permute.xlu0 %1352 }
 0x4b0   :  { %v1401_v23 = vsel %vm1400_vm3, %v1353_v9, 0.0 }
 0x4b3   :  { %v1357_v28 = vpop.permute.xlu1 %1356  ;;  %v1355_v63 = vpop.permute.xlu0 %1354 }
 0x4b4   :  { %v1402_v31 = vsel %vm1400_vm3, %v1355_v63, 0.0  ;;  %v1404_v30 = vsel %vm1400_vm3, %v1357_v28, 0.0 }
 0x4b5   :  { %v1403_v29 = vadd.f32 %v1402_v31, %v1401_v23 }
 0x4b7   :  { %v1359_v52 = vpop.permute.xlu1 %1358  ;;  %v1405_v26 = vadd.f32 %v1404_v30, %v1403_v29  ;;  %v1361_v62 = vpop.permute.xlu0 %1360 }
 0x4b8   :  { %v1406_v10 = vsel %vm1400_vm3, %v1359_v52, 0.0  ;;  %v1408_v40 = vsel %vm1400_vm3, %v1361_v62, 0.0 }
 0x4b9   :  { %v1407_v0 = vadd.f32 %v1406_v10, %v1405_v26 }
 0x4bb   :  { %v1409_v20 = vadd.f32 %v1408_v40, %v1407_v0  ;;  %v1363_v12 = vpop.permute.xlu1 %1362  ;;  %v1365_v41 = vpop.permute.xlu0 %1364 }
 0x4bc   :  { %v1410_v32 = vsel %vm1400_vm3, %v1363_v12, 0.0  ;;  %v1412_v5 = vsel %vm1400_vm3, %v1365_v41, 0.0 }
 0x4bd   :  { %v1411_v37 = vadd.f32 %v1410_v32, %v1409_v20 }
 0x4bf   :  { %v1413_v17 = vadd.f32 %v1412_v5, %v1411_v37  ;;  %v1367_v19 = vpop.permute.xlu1 %1366  ;;  %v1369_v50 = vpop.permute.xlu0 %1368 }
 0x4c0   :  { %v1414_v33 = vsel %vm1400_vm3, %v1367_v19, 0.0  ;;  %v1416_v34 = vsel %vm1400_vm3, %v1369_v50, 0.0 }
 0x4c1   :  { %v1415_v38 = vadd.f32 %v1414_v33, %v1413_v17 }
 0x4c3   :  { %v1417_v35 = vadd.f32 %v1416_v34, %v1415_v38  ;;  %v1371_v36 = vpop.permute.xlu1 %1370  ;;  %v1373_v45 = vpop.permute.xlu0 %1372 }
 0x4c4   :  { %v1418_v46 = vsel %vm1400_vm3, %v1371_v36, 0.0  ;;  %v1420_v48 = vsel %vm1400_vm3, %v1373_v45, 0.0 }
 0x4c5   :  { %v1419_v47 = vadd.f32 %v1418_v46, %v1417_v35 }
 0x4c7   :  { %v1421_v49 = vadd.f32 %v1420_v48, %v1419_v47  ;;  %v1375_v51 = vpop.permute.xlu1 %1374  ;;  %v1377_v54 = vpop.permute.xlu0 %1376 }
 0x4c8   :  { %v1422_v58 = vsel %vm1400_vm3, %v1375_v51, 0.0  ;;  %v1424_v2 = vsel %vm1400_vm3, %v1377_v54, 0.0 }
 0x4c9   :  { %v1423_v59 = vadd.f32 %v1422_v58, %v1421_v49 }
 0x4cb   :  { %v1425_v4 = vadd.f32 %v1424_v2, %v1423_v59  ;;  %v1379_v8 = vpop.permute.xlu1 %1378  ;;  %v1381_v11 = vpop.permute.xlu0 %1380 }
 0x4cc   :  { %v1426_v15 = vsel %vm1400_vm3, %v1379_v8, 0.0  ;;  %v1428_v55 = vsel %vm1400_vm3, %v1381_v11, 0.0 }
 0x4cd   :  { %v1427_v16 = vadd.f32 %v1426_v15, %v1425_v4 }
 0x4cf   :  { %v1429_v53 = vadd.f32 %v1428_v55, %v1427_v16  ;;  %v1383_v60 = vpop.permute.xlu1 %1382 }
 0x4d0   :  { %v1430_v27 = vsel %vm1400_vm3, %v1383_v60, 0.0 }
 0x4d1   :  { %v1431_v21 = vadd.f32 %v1430_v27, %v1429_v53 }
 0x4d3   :  { %1432 = vadd.xlane.f32.xlu0 %v1431_v21 }
 0x4e0   :  { %v1463_v24 = vpop.permute.xlu1 %1462 }
 0x4e4   :  { %v1467_v9 = vpop.permute.xlu1 %1466 }
 0x4e8   :  { %v1471_v28 = vpop.permute.xlu1 %1470 }
 0x4e9   :  { %1494 = vperm.xlu0 %1853, %v2486_v25  }
 0x4ec   :  { %v1475_v30 = vpop.permute.xlu1 %1474 }
 0x4f0   :  { %v1479_v10 = vpop.permute.xlu1 %1478 }
 0x4f4   :  { %v1483_v0 = vpop.permute.xlu1 %1482 }
 0x4f8   :  { %v1487_v40 = vpop.permute.xlu1 %1486 }
 0x4fc   :  { %v1491_v20 = vpop.permute.xlu1 %1490 }
 0x500   :  { %v1499_v12 = vpop.permute.xlu1 %1498 }
 0x504   :  { %v1503_v41 = vpop.permute.xlu1 %1502 }
 0x508   :  { %v1507_v32 = vpop.permute.xlu1 %1506 }
 0x50c   :  { %v1511_v37 = vpop.permute.xlu1 %1510 }
 0x510   :  { %v1515_v5 = vpop.permute.xlu1 %1514 }
 0x514   :  { %v1519_v19 = vpop.permute.xlu1 %1518 }
 0x560   :  { %v1433_v63 = vpop.xlane.xlu0 %1432 }
 0x561   :  { %v1434_v23 = vrot.slane %v1433_v63, 4 }
 0x563   :  { %v1435_v31 = vadd.f32 %v1434_v23, %v1433_v63 }
 0x565   :  { %v1436_v29 = vrot.slane %v1435_v31, 2 }
 0x567   :  { %v1437_v52 = vadd.f32 %v1436_v29, %v1435_v31 }
 0x569   :  { %v1438_v26 = vrot.slane %v1437_v52, 1 }
 0x56b   :  { %v1439_v62 = vadd.f32 %v1438_v26, %v1437_v52 }
 0x56d   :  { %1845 = vpush %v1439_v62 }
 0x59e   :  { %s1846_s1 = spop %1845 }
 0x59f   :  { %s1443_s0 = smul.f32 0.00390625, %s1846_s1 }
 0x5a1   :  { %v1444_v17 = vstv %s1443_s0 }
 0x5a2   :  { %v1445_v50 = vsub.f32 %v2456_v56, %v1444_v17  ;;  %v1446_v33 = vsub.f32 %v2460_v61, %v1444_v17  ;;  %v1447_v38 = vsub.f32 %v2462_v1, %v1444_v17  ;;  %v1448_v34 = vsub.f32 %v2468_v6, %v1444_v17 }
 0x5a3   :  { %v1449_v35 = vsub.f32 %v2470_v7, %v1444_v17  ;;  %v1450_v36 = vsub.f32 %v2476_v13, %v1444_v17  ;;  %v1451_v45 = vsub.f32 %v2478_v14, %v1444_v17  ;;  %v1452_v46 = vsub.f32 %v2484_v22, %v1444_v17 }
 0x5a4   :  { %v1453_v47 = vsub.f32 %v2486_v25, %v1444_v17  ;;  %v1454_v48 = vsub.f32 %v2492_v43, %v1444_v17  ;;  %v1455_v56 = vsub.f32 %v2494_v39, %v1444_v17  ;;  %v1456_v61 = vsub.f32 %v2500_v57, %v1444_v17  ;;  %v1495_v25 = vpop.permute.xlu0 %1494  ;;  %v1523_v57 = vpop.permute.xlu1 %1522 }
 0x5a5   :  { %v1457_v1 = vsub.f32 %v2502_v18, %v1444_v17  ;;  %v1458_v6 = vsub.f32 %v2508_v3, %v1444_v17  ;;  %v1459_v7 = vsub.f32 %v2510_v42, %v1444_v17  ;;  %v1460_v13 = vsub.f32 %v2516_v44, %v1444_v17 }
 0x5a6   :  { %v1525_v49 = vadd.f32 %v1463_v24, %v1445_v50  ;;  %v1526_v14 = vadd.f32 %v1467_v9, %v1446_v33  ;;  %v1527_v51 = vadd.f32 %v1471_v28, %v1447_v38  ;;  %v1528_v22 = vadd.f32 %v1475_v30, %v1448_v34 }
 0x5a7   :  { %v1529_v43 = vadd.f32 %v1479_v10, %v1449_v35  ;;  %v1530_v54 = vadd.f32 %v1483_v0, %v1450_v36  ;;  %v1531_v39 = vadd.f32 %v1487_v40, %v1451_v45  ;;  %v1532_v58 = vadd.f32 %v1491_v20, %v1452_v46 }
 0x5a8   :  { %v1533_v59 = vadd.f32 %v1495_v25, %v1453_v47  ;;  %v1534_v18 = vadd.f32 %v1499_v12, %v1454_v48  ;;  %v1535_v2 = vadd.f32 %v1503_v41, %v1455_v56  ;;  %v1536_v3 = vadd.f32 %v1507_v32, %v1456_v61  ;;  %1541 = vst [vmem:[#allocation2] sm:$0xff] %v1525_v49 }
 0x5a9   :  { %1542 = vst [vmem:[#allocation2 + $0x8] sm:$0xff] %v1526_v14  ;;  %1543 = vst [vmem:[#allocation2 + $0x10] sm:$0xff] %v1527_v51  ;;  %v1537_v42 = vadd.f32 %v1511_v37, %v1457_v1  ;;  %v1538_v44 = vadd.f32 %v1515_v5, %v1458_v6  ;;  %v1539_v4 = vadd.f32 %v1519_v19, %v1459_v7 }
 0x5aa   :  { %1544 = vst [vmem:[#allocation2 + $0x18] sm:$0xff] %v1528_v22  ;;  %v1540_v8 = vadd.f32 %v1523_v57, %v1460_v13  ;;  %1545 = vst [vmem:[#allocation2 + $0x20] sm:$0xff] %v1529_v43 }
 0x5ab   :  { %1546 = vst [vmem:[#allocation2 + $0x28] sm:$0xff] %v1530_v54  ;;  %1547 = vst [vmem:[#allocation2 + $0x30] sm:$0xff] %v1531_v39 }
 0x5ac   :  { %1548 = vst [vmem:[#allocation2 + $0x38] sm:$0xff] %v1532_v58  ;;  %1549 = vst [vmem:[#allocation2 + $0x40] sm:$0xff] %v1533_v59 }
 0x5ad   :  { %1550 = vst [vmem:[#allocation2 + $0x48] sm:$0xff] %v1534_v18  ;;  %1551 = vst [vmem:[#allocation2 + $0x50] sm:$0xff] %v1535_v2 }
 0x5ae   :  { %1552 = vst [vmem:[#allocation2 + $0x58] sm:$0xff] %v1536_v3  ;;  %1553 = vst [vmem:[#allocation2 + $0x60] sm:$0xff] %v1537_v42 }
 0x5af   :  { %1554 = vst [vmem:[#allocation2 + $0x68] sm:$0xff] %v1538_v44  ;;  %1555 = vst [vmem:[#allocation2 + $0x70] sm:$0xff] %v1539_v4 }
 0x5b0   :  { %1556 = vst [vmem:[#allocation2 + $0x78] sm:$0xff] %v1540_v8 }
 0x5b1   :  { %1871 = shalt.err (!%p1868_p4)
}
 0x5b2   :  { %s1872_s24 = scalar_lea.hbm %s2582_s2, 2048 }
 0x5b3   :  { %p1873_p5 = scmp.ne.s32.totalorder %s2582_s2, %s1872_s24  ;;  %p1876_p6 = scmp.lt.u32.totalorder %s1872_s24, %s2582_s2 }
 0x5b5   :  { %p1878_p7 = pnand %p1876_p6, %p1873_p5 }
 0x5b7   :  { %1881 = shalt.err (!%p1878_p7)
}
 0x5b8   :  { %s1887_s29 = smov 128   ;;  %s1888_s30 = smov 8  }
 0x5b9   :  { %1568 = dma.vmem_to_hbm [thread:$0]  %s1563_s20, 2048, %s2582_s2, [#allocation3], %s1887_s29, %s1887_s29, %s1888_s30  }
 0x5ba   :  { %1882 = dma.done.wait [#allocation3], 2048  }
 0x5bb   :  { %1883 = vsyncadd [#allocation3], 4294965248 }
 0x5bc   :  { %1572 = vsyncpa [#allocation3], 1 }

</bundles_post_ra>
